<compile_context>
chip_gen: v7x
topology: tpu7x:2x2x1
jax: 0.10.0
libtpu: 0.0.40
codegen_flags: <defaults>
</compile_context>

<pallas_src>
import functools
import math

import jax
import jax.numpy as jnp
from jax.experimental import pallas as pl
from jax.experimental.pallas import tpu as pltpu


_EPS = 1e-5  # nn.LayerNorm default


def _layernorm(v, g, b, eps):
    """LayerNorm over the last axis; statistics and affine in f32."""
    v = v.astype(jnp.float32)
    mu = jnp.mean(v, axis=-1, keepdims=True)
    var = jnp.mean(jnp.square(v - mu), axis=-1, keepdims=True)
    return (v - mu) * jax.lax.rsqrt(var + eps) * g.astype(jnp.float32) + b.astype(jnp.float32)


def _gelu_tanh(x):
    # TODO(synk): nn.GELU defaults to the exact erf formulation; the tanh
    # approximation is used here (max abs deviation ~1e-3) since erf lowering
    # is not guaranteed in Mosaic.
    c = math.sqrt(2.0 / math.pi)
    return 0.5 * x * (1.0 + jnp.tanh(c * (x + 0.044715 * x * x * x)))


# ----------------------------------------------------------------------------
# Kernels
# ----------------------------------------------------------------------------
def _linear_bias_kernel(x_ref, w_ref, b_ref, o_ref, *, compute_dtype):
    """proj_in: y = x @ W + b (bf16 operands, f32 accumulation)."""
    Bb, N, E = x_ref.shape
    Dout = o_ref.shape[-1]
    x2 = x_ref[...].reshape(Bb * N, E).astype(compute_dtype)
    y = jnp.dot(x2, w_ref[...], preferred_element_type=jnp.float32)
    y = y + b_ref[...].astype(jnp.float32)
    o_ref[...] = y.reshape(Bb, N, Dout).astype(o_ref.dtype)


def _resampler_layer_kernel(x_ref, lat_ref,
                            g1_ref, b1_ref, g2_ref, b2_ref,
                            wqkv_ref, wkv_ref, wo_ref,
                            fg_ref, fb_ref, w1_ref, w2_ref,
                            o_ref, attn_sc,
                            *, heads, dim_head, eps, compute_dtype, recip_approx):
    """One Resampler layer: PerceiverAttention + residual, FeedForward + residual."""
    Bb, N1, D = x_ref.shape
    _, N2, _ = lat_ref.shape
    inner = heads * dim_head

    # Flatten the batch block into the row (sublane) dimension for the matmuls
    # so the MXU sees block_b*rows per pass.
    x2 = x_ref[...].reshape(Bb * N1, D)
    lat2 = lat_ref[...].reshape(Bb * N2, D).astype(jnp.float32)

    x_n = _layernorm(x2, g1_ref[...], b1_ref[...], eps).astype(compute_dtype)
    l_n = _layernorm(lat2, g2_ref[...], b2_ref[...], eps).astype(compute_dtype)

    # Two fused wide projections instead of five narrow ones; bf16 operands,
    # f32 MXU accumulation.  The 1/sqrt(dim_head) softmax scale is already
    # folded into the Wq columns of wqkv by the wrapper.
    kv_x = jnp.dot(x_n, wkv_ref[...], preferred_element_type=jnp.float32)    # (Bb*N1, 2*inner)
    qkv_l = jnp.dot(l_n, wqkv_ref[...], preferred_element_type=jnp.float32)  # (Bb*N2, 3*inner)

    kx3 = kv_x[:, :inner].reshape(Bb, N1, inner).astype(compute_dtype)
    vx3 = kv_x[:, inner:].reshape(Bb, N1, inner).astype(compute_dtype)
    q3 = qkv_l[:, :inner].reshape(Bb, N2, inner).astype(compute_dtype)
    kl3 = qkv_l[:, inner:2 * inner].reshape(Bb, N2, inner).astype(compute_dtype)
    vl3 = qkv_l[:, 2 * inner:].reshape(Bb, N2, inner).astype(compute_dtype)

    # Per-head attention over two key segments (image tokens, latents) that
    # share a joint softmax — equivalent to softmax over cat((x, latents)) but
    # with no sublane-axis concat.  Head outputs land directly in the f32 VMEM
    # scratch (no lane-axis concatenate).
    # TODO(synk): for production dim_head=64, process heads in 128-lane pairs
    # so the q/k/v slices and the scratch stores are lane-aligned.
    for h in range(heads):
        sl = slice(h * dim_head, (h + 1) * dim_head)
        qh = q3[:, :, sl]
        s_x = jnp.einsum("bqd,bkd->bqk", qh, kx3[:, :, sl],
                         preferred_element_type=jnp.float32)                 # (Bb, N2, N1)
        s_l = jnp.einsum("bqd,bkd->bqk", qh, kl3[:, :, sl],
                         preferred_element_type=jnp.float32)                 # (Bb, N2, N2)
        m = jnp.maximum(jnp.max(s_x, axis=-1, keepdims=True),
                        jnp.max(s_l, axis=-1, keepdims=True))
        p_x = jnp.exp(s_x - m)
        p_l = jnp.exp(s_l - m)
        denom = (jnp.sum(p_x, axis=-1, keepdims=True)
                 + jnp.sum(p_l, axis=-1, keepdims=True))
        inv = pl.reciprocal(denom, approx=recip_approx)                      # EUP slot
        pv = (jnp.einsum("bqk,bkd->bqd", p_x.astype(compute_dtype), vx3[:, :, sl],
                         preferred_element_type=jnp.float32)
              + jnp.einsum("bqk,bkd->bqd", p_l.astype(compute_dtype), vl3[:, :, sl],
                           preferred_element_type=jnp.float32))
        attn_sc[:, :, sl] = pv * inv                                         # (Bb, N2, dh) f32

    attn = attn_sc[...].reshape(Bb * N2, inner).astype(compute_dtype)
    attn_out = jnp.dot(attn, wo_ref[...], preferred_element_type=jnp.float32)  # (Bb*N2, D)

    lat_res = lat2 + attn_out                                                # residual 1 (f32)

    # FeedForward: LayerNorm -> Linear -> GELU -> Linear, + residual.
    h_n = _layernorm(lat_res, fg_ref[...], fb_ref[...], eps).astype(compute_dtype)
    h1 = jnp.dot(h_n, w1_ref[...], preferred_element_type=jnp.float32)
    h1 = _gelu_tanh(h1).astype(compute_dtype)
    h2 = jnp.dot(h1, w2_ref[...], preferred_element_type=jnp.float32)
    out = lat_res + h2                                                       # residual 2 (f32)

    o_ref[...] = out.reshape(Bb, N2, D).astype(o_ref.dtype)


def _proj_out_norm_kernel(l_ref, w_ref, b_ref, g_ref, beta_ref, o_ref, *,
                          eps, compute_dtype):
    """proj_out (linear + bias) fused with norm_out (LayerNorm)."""
    Bb, N, D = l_ref.shape
    Dout = o_ref.shape[-1]
    l2 = l_ref[...].reshape(Bb * N, D).astype(compute_dtype)
    y = jnp.dot(l2, w_ref[...], preferred_element_type=jnp.float32)
    y = y + b_ref[...].astype(jnp.float32)
    y = _layernorm(y, g_ref[...], beta_ref[...], eps)
    o_ref[...] = y.reshape(Bb, N, Dout).astype(o_ref.dtype)


# ----------------------------------------------------------------------------
# Wrapper
# ----------------------------------------------------------------------------
def _vmem_spec():
    # Whole-array operand resident in VMEM (not pipelined => single-buffered),
    # so constant weights are not double-buffered every grid step.
    return pl.BlockSpec(memory_space=pltpu.MemorySpace.VMEM)


def _block_spec(block_b, *rest):
    rest = tuple(rest)
    n = len(rest)
    return pl.BlockSpec((block_b,) + rest, lambda i: (i,) + (0,) * n)


def _default_block_b(B, N2, target_rows=256):
    """Pick block_b so block_b*N2 approaches the MXU row width while keeping
    the batch grid >= 2 (feeds both v7x TensorCores)."""
    divisors = [d for d in range(1, B + 1) if B % d == 0]
    for d in divisors:  # smallest divisor meeting the row target with grid >= 2
        if d * N2 >= target_rows and B // d >= 2:
            return d
    cands = [d for d in divisors if B // d >= 2]
    return max(cands) if cands else B


def _vmem_limit_bytes():
    """~85% of the detected physical VMEM, capped at 112 MiB (leaves headroom
    for compiler scratch; the fallback of ~54 MiB is safe on v7x's 64 MiB)."""
    cap = 64 * 1024 * 1024
    try:
        info = pltpu.get_tpu_info()
        cap = int(getattr(info, "vmem_capacity_bytes", cap))
    except Exception:
        pass
    return min(int(cap * 0.85), 112 * 1024 * 1024)


def resampler_forward(x, params, *, heads, dim_head, eps=_EPS, block_b=None,
                      compute_dtype=jnp.bfloat16):
    """Pallas forward of the Resampler (apply_pos_emb=False, num_latents_mean_pooled=0)."""
    B, N1, E = x.shape
    latents_p = params["latents"]                    # (1, num_queries, dim)
    _, N2, D = latents_p.shape
    Dout = params["proj_out_w"].shape[-1]
    inner = heads * dim_head

    if block_b is None:
        block_b = _default_block_b(B, N2)
    assert B % block_b == 0, (B, block_b)
    grid = (B // block_b,)

    cparams = pltpu.CompilerParams(
        dimension_semantics=("parallel",),
        vmem_limit_bytes=_vmem_limit_bytes())

    cdt = compute_dtype
    f32 = jnp.float32
    recip_approx = (jnp.dtype(cdt) != jnp.dtype(jnp.float32))

    # ---- proj_in (Linear with bias); x_proj stored in compute dtype (bf16 fast
    # path) since it is re-streamed from HBM once per layer. ----
    x_proj = pl.pallas_call(
        functools.partial(_linear_bias_kernel, compute_dtype=cdt),
        out_shape=jax.ShapeDtypeStruct((B, N1, D), cdt),
        grid=grid,
        in_specs=[_block_spec(block_b, N1, E), _vmem_spec(), _vmem_spec()],
        out_specs=_block_spec(block_b, N1, D),
        compiler_params=cparams,
    )(x, params["proj_in_w"].astype(cdt), params["proj_in_b"].astype(f32))

    # Residual stream (latents) stays in f32 across layers.
    latents = jnp.broadcast_to(latents_p.astype(f32), (B, N2, D))

    # Fold the full softmax scale (dim_head**-0.25 on q and on k) into Wq.
    q_scale = 1.0 / math.sqrt(dim_head)

    layer_kernel = functools.partial(
        _resampler_layer_kernel, heads=heads, dim_head=dim_head, eps=eps,
        compute_dtype=cdt, recip_approx=recip_approx)

    # TODO(synk): on v5e/v6e (128 MiB VMEM) two Resampler layers could be fused
    # per pallas_call to halve the per-layer HBM re-read of x_proj.
    for lp in params["layers"]:
        wqkv = jnp.concatenate([lp["wq"] * q_scale, lp["wk"], lp["wv"]], axis=-1)
        wkv = jnp.concatenate([lp["wk"], lp["wv"]], axis=-1)
        latents = pl.pallas_call(
            layer_kernel,
            out_shape=jax.ShapeDtypeStruct((B, N2, D), f32),
            grid=grid,
            in_specs=([_block_spec(block_b, N1, D), _block_spec(block_b, N2, D)]
                      + [_vmem_spec() for _ in range(11)]),
            out_specs=_block_spec(block_b, N2, D),
            scratch_shapes=[pltpu.VMEM((block_b, N2, inner), jnp.float32)],
            compiler_params=cparams,
        )(x_proj, latents,
          lp["g1"].astype(f32), lp["b1"].astype(f32),
          lp["g2"].astype(f32), lp["b2"].astype(f32),
          wqkv.astype(cdt), wkv.astype(cdt), lp["wout"].astype(cdt),
          lp["fg"].astype(f32), lp["fb"].astype(f32),
          lp["w1"].astype(cdt), lp["w2"].astype(cdt))

    # ---- proj_out (Linear with bias) + norm_out (LayerNorm) ----
    # TODO(synk): if Dout < 128 (toy shapes only) the output stores are masked
    # vst; production dims (>=768) are already lane-dense.
    out = pl.pallas_call(
        functools.partial(_proj_out_norm_kernel, eps=eps, compute_dtype=cdt),
        out_shape=jax.ShapeDtypeStruct((B, N2, Dout), x.dtype),
        grid=grid,
        in_specs=([_block_spec(block_b, N2, D)] + [_vmem_spec() for _ in range(4)]),
        out_specs=_block_spec(block_b, N2, Dout),
        compiler_params=cparams,
    )(latents, params["proj_out_w"].astype(cdt), params["proj_out_b"].astype(f32),
      params["no_g"].astype(f32), params["no_b"].astype(f32))

    return out


# ----------------------------------------------------------------------------
# Pure-JAX f32 reference (mirrors the PyTorch module forward)
# ----------------------------------------------------------------------------
def resampler_ref(x, params, *, heads, dim_head, eps=_EPS):
    def ln(v, g, b):
        mu = jnp.mean(v, axis=-1, keepdims=True)
        var = jnp.mean(jnp.square(v - mu), axis=-1, keepdims=True)
        return (v - mu) / jnp.sqrt(var + eps) * g + b

    B = x.shape[0]
    inner = heads * dim_head
    scale = 1.0 / math.sqrt(math.sqrt(dim_head))

    lat = jnp.broadcast_to(params["latents"], (B,) + params["latents"].shape[1:])
    x = x @ params["proj_in_w"] + params["proj_in_b"]

    def reshape_heads(t):
        b, L, _ = t.shape
        return t.reshape(b, L, heads, dim_head).transpose(0, 2, 1, 3)

    for lp in params["layers"]:
        x_n = ln(x, lp["g1"], lp["b1"])
        l_n = ln(lat, lp["g2"], lp["b2"])
        q = l_n @ lp["wq"]
        kv_in = jnp.concatenate([x_n, l_n], axis=1)
        k = kv_in @ lp["wk"]
        v = kv_in @ lp["wv"]
        qh, kh, vh = reshape_heads(q), reshape_heads(k), reshape_heads(v)
        w = jnp.einsum("bhqd,bhkd->bhqk", qh * scale, kh * scale)
        w = jax.nn.softmax(w.astype(jnp.float32), axis=-1).astype(w.dtype)
        o = jnp.einsum("bhqk,bhkd->bhqd", w, vh)
        o = o.transpose(0, 2, 1, 3).reshape(B, lat.shape[1], inner)
        lat = lat + o @ lp["wout"]
        h = ln(lat, lp["fg"], lp["fb"])
        h = _gelu_tanh(h @ lp["w1"])
        lat = lat + h @ lp["w2"]

    out = lat @ params["proj_out_w"] + params["proj_out_b"]
    return ln(out, params["no_g"], params["no_b"])


if __name__ == "__main__":
    # Small shapes consistent with the module (depth=2 keeps the test quick).
    B, N1, N2 = 4, 16, 8            # batch, image tokens, num_queries
    E, D, Dout = 32, 64, 64         # embedding_dim, dim, output_dim
    heads, dim_head = 4, 16         # inner_dim = 64
    ff_mult, depth = 2, 2
    inner = heads * dim_head
    ff_inner = D * ff_mult

    key = jax.random.PRNGKey(0)
    keys = iter(jax.random.split(key, 64))

    def rand(shape, scale):
        return scale * jax.random.normal(next(keys), shape, jnp.float32)

    params = {
        "latents": rand((1, N2, D), D ** -0.5),
        "proj_in_w": rand((E, D), E ** -0.5),
        "proj_in_b": rand((1, D), 0.02),
        "proj_out_w": rand((D, Dout), D ** -0.5),
        "proj_out_b": rand((1, Dout), 0.02),
        "no_g": 1.0 + rand((1, Dout), 0.05),
        "no_b": rand((1, Dout), 0.05),
        "layers": [],
    }
    for _ in range(depth):
        params["layers"].append({
            "g1": 1.0 + rand((1, D), 0.05), "b1": rand((1, D), 0.05),
            "g2": 1.0 + rand((1, D), 0.05), "b2": rand((1, D), 0.05),
            "wq": rand((D, inner), D ** -0.5),
            "wk": rand((D, inner), D ** -0.5),
            "wv": rand((D, inner), D ** -0.5),
            "wout": rand((inner, D), inner ** -0.5),
            "fg": 1.0 + rand((1, D), 0.05), "fb": rand((1, D), 0.05),
            "w1": rand((D, ff_inner), D ** -0.5),
            "w2": rand((ff_inner, D), ff_inner ** -0.5),
        })

    x = jax.random.normal(next(keys), (B, N1, E), jnp.float32)

    ref = resampler_ref(x, params, heads=heads, dim_head=dim_head)

    # f32-compute variant: validates the fused kernel math tightly (exact
    # softmax reciprocal on this path).
    fwd_f32 = jax.jit(functools.partial(resampler_forward, heads=heads,
                                        dim_head=dim_head,
                                        compute_dtype=jnp.float32))
    out_f32 = jax.block_until_ready(fwd_f32(x, params))
    assert out_f32.shape == (B, N2, Dout), out_f32.shape
    err_f32 = float(jnp.max(jnp.abs(out_f32 - ref)))
    assert bool(jnp.allclose(out_f32, ref, atol=2e-2, rtol=2e-2)), err_f32

    # bf16-compute variant (default fast path): bf16 MXU operands, f32
    # accumulation, bf16 x_proj storage, f32 latent residual stream.
    fwd_bf16 = jax.jit(functools.partial(resampler_forward, heads=heads,
                                         dim_head=dim_head,
                                         compute_dtype=jnp.bfloat16))
    out = jax.block_until_ready(fwd_bf16(x, params))
    assert out.shape == (B, N2, Dout), out.shape
    err_bf16 = float(jnp.max(jnp.abs(out - ref)))
    assert bool(jnp.allclose(out, ref, atol=5e-2, rtol=5e-2)), err_bf16

    print("KERNEL_OK")
</pallas_src>

<mosaic_0001>
module attributes {stable_mosaic.version = 11 : i64} {
  func.func @_linear_bias_kernel(%arg0: i32, %arg1: memref<2x16x32xf32, #tpu.memory_space<vmem>>, %arg2: memref<32x64xf32, #tpu.memory_space<vmem>>, %arg3: memref<1x64xf32, #tpu.memory_space<vmem>>, %arg4: memref<2x16x64xf32, #tpu.memory_space<vmem>>) attributes {dimension_semantics = [#tpu.dimension_semantics<parallel>], iteration_bounds = array<i64: 2>, scalar_prefetch = 0 : i64, scratch_operands = 0 : i64, tpu.core_type = #tpu.core_type<tc>, window_params = [{transform_indices = @transform_0, window_bounds = array<i64: 2, 16, 32>}, {pipeline_mode = #tpu.pipeline_mode<synchronous>, transform_indices = @transform_1, window_bounds = array<i64: 32, 64>}, {pipeline_mode = #tpu.pipeline_mode<synchronous>, transform_indices = @transform_2, window_bounds = array<i64: 1, 64>}, {transform_indices = @transform_3, window_bounds = array<i64: 2, 16, 64>}]} {
    %c0 = arith.constant 0 : index
    %c0_0 = arith.constant 0 : index
    %c0_1 = arith.constant 0 : index
    %0 = vector.load %arg1[%c0, %c0_0, %c0_1] : memref<2x16x32xf32, #tpu.memory_space<vmem>>, vector<2x16x32xf32>
    %1 = vector.shape_cast %0 : vector<2x16x32xf32> to vector<32x32xf32>
    %c0_2 = arith.constant 0 : index
    %c0_3 = arith.constant 0 : index
    %2 = vector.load %arg2[%c0_2, %c0_3] : memref<32x64xf32, #tpu.memory_space<vmem>>, vector<32x64xf32>
    %cst = arith.constant dense<0.000000e+00> : vector<32x64xf32>
    %3 = tpu.matmul %1, %2, %cst {dimension_numbers = #tpu.dot_dimension_numbers<[1], [0], [0], [1], [0, 0, 1, 1], [], []>} : vector<32x32xf32>, vector<32x64xf32>, vector<32x64xf32> -> vector<32x64xf32>
    %c0_4 = arith.constant 0 : index
    %c0_5 = arith.constant 0 : index
    %4 = vector.load %arg3[%c0_4, %c0_5] : memref<1x64xf32, #tpu.memory_space<vmem>>, vector<1x64xf32>
    %5 = vector.broadcast %4 : vector<1x64xf32> to vector<32x64xf32>
    %6 = arith.addf %3, %5 : vector<32x64xf32>
    %7 = vector.shape_cast %6 : vector<32x64xf32> to vector<2x16x64xf32>
    %c0_6 = arith.constant 0 : index
    %c0_7 = arith.constant 0 : index
    %c0_8 = arith.constant 0 : index
    %8 = vector.load %arg4[%c0_6, %c0_7, %c0_8] : memref<2x16x64xf32, #tpu.memory_space<vmem>>, vector<2x16x64xf32>
    tpu.vector_store %arg4[%c0_6, %c0_7, %c0_8], %7 {strides = array<i32>} : memref<2x16x64xf32, #tpu.memory_space<vmem>>, vector<2x16x64xf32>,
    return
  }
  func.func @transform_0(%arg0: i32) -> (i32, i32, i32) {
    %c0_i32 = arith.constant 0 : i32
    %c0_i32_0 = arith.constant 0 : i32
    %c0_i32_1 = arith.constant 0 : i32
    return %arg0, %c0_i32, %c0_i32_0 : i32, i32, i32
  }
  func.func @transform_1(%arg0: i32) -> (i32, i32) {
    %c0_i32 = arith.constant 0 : i32
    %c0_i32_0 = arith.constant 0 : i32
    %c0_i32_1 = arith.constant 0 : i32
    return %c0_i32, %c0_i32_0 : i32, i32
  }
  func.func @transform_2(%arg0: i32) -> (i32, i32) {
    %c0_i32 = arith.constant 0 : i32
    %c0_i32_0 = arith.constant 0 : i32
    %c0_i32_1 = arith.constant 0 : i32
    return %c0_i32, %c0_i32_0 : i32, i32
  }
  func.func @transform_3(%arg0: i32) -> (i32, i32, i32) {
    %c0_i32 = arith.constant 0 : i32
    %c0_i32_0 = arith.constant 0 : i32
    %c0_i32_1 = arith.constant 0 : i32
    return %arg0, %c0_i32, %c0_i32_0 : i32, i32, i32
  }
}

module attributes {stable_mosaic.version = 11 : i64} {
  func.func @_proj_out_norm_kernel(%arg0: i32, %arg1: memref<2x8x64xf32, #tpu.memory_space<vmem>>, %arg2: memref<64x64xf32, #tpu.memory_space<vmem>>, %arg3: memref<1x64xf32, #tpu.memory_space<vmem>>, %arg4: memref<1x64xf32, #tpu.memory_space<vmem>>, %arg5: memref<1x64xf32, #tpu.memory_space<vmem>>, %arg6: memref<2x8x64xf32, #tpu.memory_space<vmem>>) attributes {dimension_semantics = [#tpu.dimension_semantics<parallel>], iteration_bounds = array<i64: 2>, scalar_prefetch = 0 : i64, scratch_operands = 0 : i64, tpu.core_type = #tpu.core_type<tc>, window_params = [{transform_indices = @transform_0, window_bounds = array<i64: 2, 8, 64>}, {pipeline_mode = #tpu.pipeline_mode<synchronous>, transform_indices = @transform_1, window_bounds = array<i64: 64, 64>}, {pipeline_mode = #tpu.pipeline_mode<synchronous>, transform_indices = @transform_2, window_bounds = array<i64: 1, 64>}, {pipeline_mode = #tpu.pipeline_mode<synchronous>, transform_indices = @transform_3, window_bounds = array<i64: 1, 64>}, {pipeline_mode = #tpu.pipeline_mode<synchronous>, transform_indices = @transform_4, window_bounds = array<i64: 1, 64>}, {transform_indices = @transform_5, window_bounds = array<i64: 2, 8, 64>}]} {
    %c0 = arith.constant 0 : index
    %c0_0 = arith.constant 0 : index
    %c0_1 = arith.constant 0 : index
    %0 = vector.load %arg1[%c0, %c0_0, %c0_1] : memref<2x8x64xf32, #tpu.memory_space<vmem>>, vector<2x8x64xf32>
    %1 = vector.shape_cast %0 : vector<2x8x64xf32> to vector<16x64xf32>
    %c0_2 = arith.constant 0 : index
    %c0_3 = arith.constant 0 : index
    %2 = vector.load %arg2[%c0_2, %c0_3] : memref<64x64xf32, #tpu.memory_space<vmem>>, vector<64x64xf32>
    %cst = arith.constant dense<0.000000e+00> : vector<16x64xf32>
    %3 = tpu.matmul %1, %2, %cst {dimension_numbers = #tpu.dot_dimension_numbers<[1], [0], [0], [1], [0, 0, 1, 1], [], []>} : vector<16x64xf32>, vector<64x64xf32>, vector<16x64xf32> -> vector<16x64xf32>
    %c0_4 = arith.constant 0 : index
    %c0_5 = arith.constant 0 : index
    %4 = vector.load %arg3[%c0_4, %c0_5] : memref<1x64xf32, #tpu.memory_space<vmem>>, vector<1x64xf32>
    %5 = vector.broadcast %4 : vector<1x64xf32> to vector<16x64xf32>
    %6 = arith.addf %3, %5 : vector<16x64xf32>
    %c0_6 = arith.constant 0 : index
    %c0_7 = arith.constant 0 : index
    %7 = vector.load %arg4[%c0_6, %c0_7] : memref<1x64xf32, #tpu.memory_space<vmem>>, vector<1x64xf32>
    %c0_8 = arith.constant 0 : index
    %c0_9 = arith.constant 0 : index
    %8 = vector.load %arg5[%c0_8, %c0_9] : memref<1x64xf32, #tpu.memory_space<vmem>>, vector<1x64xf32>
    %cst_10 = arith.constant dense<0.000000e+00> : vector<16xf32>
    %9 = vector.multi_reduction <add>, %6, %cst_10 [1] : vector<16x64xf32> to vector<16xf32>
    %10 = vector.shape_cast %9 : vector<16xf32> to vector<16x1xf32>
    %cst_11 = arith.constant 6.400000e+01 : f32
    %11 = vector.broadcast %cst_11 : f32 to vector<16x1xf32>
    %12 = arith.divf %10, %11 : vector<16x1xf32>
    %13 = vector.broadcast %12 : vector<16x1xf32> to vector<16x64xf32>
    %14 = arith.subf %6, %13 : vector<16x64xf32>
    %15 = arith.mulf %14, %14 : vector<16x64xf32>
    %cst_12 = arith.constant dense<0.000000e+00> : vector<16xf32>
    %16 = vector.multi_reduction <add>, %15, %cst_12 [1] : vector<16x64xf32> to vector<16xf32>
    %17 = vector.shape_cast %16 : vector<16xf32> to vector<16x1xf32>
    %cst_13 = arith.constant 6.400000e+01 : f32
    %18 = vector.broadcast %cst_13 : f32 to vector<16x1xf32>
    %19 = arith.divf %17, %18 : vector<16x1xf32>
    %20 = vector.broadcast %12 : vector<16x1xf32> to vector<16x64xf32>
    %21 = arith.subf %6, %20 : vector<16x64xf32>
    %cst_14 = arith.constant 9.99999974E-6 : f32
    %22 = vector.broadcast %cst_14 : f32 to vector<16x1xf32>
    %23 = arith.addf %19, %22 : vector<16x1xf32>
    %24 = math.rsqrt %23 : vector<16x1xf32>
    %25 = vector.broadcast %24 : vector<16x1xf32> to vector<16x64xf32>
    %26 = arith.mulf %21, %25 : vector<16x64xf32>
    %27 = vector.broadcast %7 : vector<1x64xf32> to vector<16x64xf32>
    %28 = arith.mulf %26, %27 : vector<16x64xf32>
    %29 = vector.broadcast %8 : vector<1x64xf32> to vector<16x64xf32>
    %30 = arith.addf %28, %29 : vector<16x64xf32>
    %31 = vector.shape_cast %30 : vector<16x64xf32> to vector<2x8x64xf32>
    %c0_15 = arith.constant 0 : index
    %c0_16 = arith.constant 0 : index
    %c0_17 = arith.constant 0 : index
    %32 = vector.load %arg6[%c0_15, %c0_16, %c0_17] : memref<2x8x64xf32, #tpu.memory_space<vmem>>, vector<2x8x64xf32>
    tpu.vector_store %arg6[%c0_15, %c0_16, %c0_17], %31 {strides = array<i32>} : memref<2x8x64xf32, #tpu.memory_space<vmem>>, vector<2x8x64xf32>,
    return
  }
  func.func @transform_0(%arg0: i32) -> (i32, i32, i32) {
    %c0_i32 = arith.constant 0 : i32
    %c0_i32_0 = arith.constant 0 : i32
    %c0_i32_1 = arith.constant 0 : i32
    return %arg0, %c0_i32, %c0_i32_0 : i32, i32, i32
  }
  func.func @transform_1(%arg0: i32) -> (i32, i32) {
    %c0_i32 = arith.constant 0 : i32
    %c0_i32_0 = arith.constant 0 : i32
    %c0_i32_1 = arith.constant 0 : i32
    return %c0_i32, %c0_i32_0 : i32, i32
  }
  func.func @transform_2(%arg0: i32) -> (i32, i32) {
    %c0_i32 = arith.constant 0 : i32
    %c0_i32_0 = arith.constant 0 : i32
    %c0_i32_1 = arith.constant 0 : i32
    return %c0_i32, %c0_i32_0 : i32, i32
  }
  func.func @transform_3(%arg0: i32) -> (i32, i32) {
    %c0_i32 = arith.constant 0 : i32
    %c0_i32_0 = arith.constant 0 : i32
    %c0_i32_1 = arith.constant 0 : i32
    return %c0_i32, %c0_i32_0 : i32, i32
  }
  func.func @transform_4(%arg0: i32) -> (i32, i32) {
    %c0_i32 = arith.constant 0 : i32
    %c0_i32_0 = arith.constant 0 : i32
    %c0_i32_1 = arith.constant 0 : i32
    return %c0_i32, %c0_i32_0 : i32, i32
  }
  func.func @transform_5(%arg0: i32) -> (i32, i32, i32) {
    %c0_i32 = arith.constant 0 : i32
    %c0_i32_0 = arith.constant 0 : i32
    %c0_i32_1 = arith.constant 0 : i32
    return %arg0, %c0_i32, %c0_i32_0 : i32, i32, i32
  }
}

module attributes {stable_mosaic.version = 11 : i64} {
  func.func @_resampler_layer_kernel(%arg0: i32, %arg1: memref<2x16x64xf32, #tpu.memory_space<vmem>>, %arg2: memref<2x8x64xf32, #tpu.memory_space<vmem>>, %arg3: memref<1x64xf32, #tpu.memory_space<vmem>>, %arg4: memref<1x64xf32, #tpu.memory_space<vmem>>, %arg5: memref<1x64xf32, #tpu.memory_space<vmem>>, %arg6: memref<1x64xf32, #tpu.memory_space<vmem>>, %arg7: memref<64x192xf32, #tpu.memory_space<vmem>>, %arg8: memref<64x128xf32, #tpu.memory_space<vmem>>, %arg9: memref<64x64xf32, #tpu.memory_space<vmem>>, %arg10: memref<1x64xf32, #tpu.memory_space<vmem>>, %arg11: memref<1x64xf32, #tpu.memory_space<vmem>>, %arg12: memref<64x128xf32, #tpu.memory_space<vmem>>, %arg13: memref<128x64xf32, #tpu.memory_space<vmem>>, %arg14: memref<2x8x64xf32, #tpu.memory_space<vmem>>, %arg15: memref<2x8x64xf32, #tpu.memory_space<vmem>>) attributes {dimension_semantics = [#tpu.dimension_semantics<parallel>], iteration_bounds = array<i64: 2>, scalar_prefetch = 0 : i64, scratch_operands = 1 : i64, tpu.core_type = #tpu.core_type<tc>, window_params = [{transform_indices = @transform_0, window_bounds = array<i64: 2, 16, 64>}, {transform_indices = @transform_1, window_bounds = array<i64: 2, 8, 64>}, {pipeline_mode = #tpu.pipeline_mode<synchronous>, transform_indices = @transform_2, window_bounds = array<i64: 1, 64>}, {pipeline_mode = #tpu.pipeline_mode<synchronous>, transform_indices = @transform_3, window_bounds = array<i64: 1, 64>}, {pipeline_mode = #tpu.pipeline_mode<synchronous>, transform_indices = @transform_4, window_bounds = array<i64: 1, 64>}, {pipeline_mode = #tpu.pipeline_mode<synchronous>, transform_indices = @transform_5, window_bounds = array<i64: 1, 64>}, {pipeline_mode = #tpu.pipeline_mode<synchronous>, transform_indices = @transform_6, window_bounds = array<i64: 64, 192>}, {pipeline_mode = #tpu.pipeline_mode<synchronous>, transform_indices = @transform_7, window_bounds = array<i64: 64, 128>}, {pipeline_mode = #tpu.pipeline_mode<synchronous>, transform_indices = @transform_8, window_bounds = array<i64: 64, 64>}, {pipeline_mode = #tpu.pipeline_mode<synchronous>, transform_indices = @transform_9, window_bounds = array<i64: 1, 64>}, {pipeline_mode = #tpu.pipeline_mode<synchronous>, transform_indices = @transform_10, window_bounds = array<i64: 1, 64>}, {pipeline_mode = #tpu.pipeline_mode<synchronous>, transform_indices = @transform_11, window_bounds = array<i64: 64, 128>}, {pipeline_mode = #tpu.pipeline_mode<synchronous>, transform_indices = @transform_12, window_bounds = array<i64: 128, 64>}, {transform_indices = @transform_13, window_bounds = array<i64: 2, 8, 64>}]} {
    %c0 = arith.constant 0 : index
    %c0_0 = arith.constant 0 : index
    %c0_1 = arith.constant 0 : index
    %0 = vector.load %arg1[%c0, %c0_0, %c0_1] : memref<2x16x64xf32, #tpu.memory_space<vmem>>, vector<2x16x64xf32>
    %1 = vector.shape_cast %0 : vector<2x16x64xf32> to vector<32x64xf32>
    %c0_2 = arith.constant 0 : index
    %c0_3 = arith.constant 0 : index
    %c0_4 = arith.constant 0 : index
    %2 = vector.load %arg2[%c0_2, %c0_3, %c0_4] : memref<2x8x64xf32, #tpu.memory_space<vmem>>, vector<2x8x64xf32>
    %3 = vector.shape_cast %2 : vector<2x8x64xf32> to vector<16x64xf32>
    %c0_5 = arith.constant 0 : index
    %c0_6 = arith.constant 0 : index
    %4 = vector.load %arg3[%c0_5, %c0_6] : memref<1x64xf32, #tpu.memory_space<vmem>>, vector<1x64xf32>
    %c0_7 = arith.constant 0 : index
    %c0_8 = arith.constant 0 : index
    %5 = vector.load %arg4[%c0_7, %c0_8] : memref<1x64xf32, #tpu.memory_space<vmem>>, vector<1x64xf32>
    %cst = arith.constant dense<0.000000e+00> : vector<32xf32>
    %6 = vector.multi_reduction <add>, %1, %cst [1] : vector<32x64xf32> to vector<32xf32>
    %7 = vector.shape_cast %6 : vector<32xf32> to vector<32x1xf32>
    %cst_9 = arith.constant 6.400000e+01 : f32
    %8 = vector.broadcast %cst_9 : f32 to vector<32x1xf32>
    %9 = arith.divf %7, %8 : vector<32x1xf32>
    %10 = vector.broadcast %9 : vector<32x1xf32> to vector<32x64xf32>
    %11 = arith.subf %1, %10 : vector<32x64xf32>
    %12 = arith.mulf %11, %11 : vector<32x64xf32>
    %cst_10 = arith.constant dense<0.000000e+00> : vector<32xf32>
    %13 = vector.multi_reduction <add>, %12, %cst_10 [1] : vector<32x64xf32> to vector<32xf32>
    %14 = vector.shape_cast %13 : vector<32xf32> to vector<32x1xf32>
    %cst_11 = arith.constant 6.400000e+01 : f32
    %15 = vector.broadcast %cst_11 : f32 to vector<32x1xf32>
    %16 = arith.divf %14, %15 : vector<32x1xf32>
    %17 = vector.broadcast %9 : vector<32x1xf32> to vector<32x64xf32>
    %18 = arith.subf %1, %17 : vector<32x64xf32>
    %cst_12 = arith.constant 9.99999974E-6 : f32
    %19 = vector.broadcast %cst_12 : f32 to vector<32x1xf32>
    %20 = arith.addf %16, %19 : vector<32x1xf32>
    %21 = math.rsqrt %20 : vector<32x1xf32>
    %22 = vector.broadcast %21 : vector<32x1xf32> to vector<32x64xf32>
    %23 = arith.mulf %18, %22 : vector<32x64xf32>
    %24 = vector.broadcast %4 : vector<1x64xf32> to vector<32x64xf32>
    %25 = arith.mulf %23, %24 : vector<32x64xf32>
    %26 = vector.broadcast %5 : vector<1x64xf32> to vector<32x64xf32>
    %27 = arith.addf %25, %26 : vector<32x64xf32>
    %c0_13 = arith.constant 0 : index
    %c0_14 = arith.constant 0 : index
    %28 = vector.load %arg5[%c0_13, %c0_14] : memref<1x64xf32, #tpu.memory_space<vmem>>, vector<1x64xf32>
    %c0_15 = arith.constant 0 : index
    %c0_16 = arith.constant 0 : index
    %29 = vector.load %arg6[%c0_15, %c0_16] : memref<1x64xf32, #tpu.memory_space<vmem>>, vector<1x64xf32>
    %cst_17 = arith.constant dense<0.000000e+00> : vector<16xf32>
    %30 = vector.multi_reduction <add>, %3, %cst_17 [1] : vector<16x64xf32> to vector<16xf32>
    %31 = vector.shape_cast %30 : vector<16xf32> to vector<16x1xf32>
    %cst_18 = arith.constant 6.400000e+01 : f32
    %32 = vector.broadcast %cst_18 : f32 to vector<16x1xf32>
    %33 = arith.divf %31, %32 : vector<16x1xf32>
    %34 = vector.broadcast %33 : vector<16x1xf32> to vector<16x64xf32>
    %35 = arith.subf %3, %34 : vector<16x64xf32>
    %36 = arith.mulf %35, %35 : vector<16x64xf32>
    %cst_19 = arith.constant dense<0.000000e+00> : vector<16xf32>
    %37 = vector.multi_reduction <add>, %36, %cst_19 [1] : vector<16x64xf32> to vector<16xf32>
    %38 = vector.shape_cast %37 : vector<16xf32> to vector<16x1xf32>
    %cst_20 = arith.constant 6.400000e+01 : f32
    %39 = vector.broadcast %cst_20 : f32 to vector<16x1xf32>
    %40 = arith.divf %38, %39 : vector<16x1xf32>
    %41 = vector.broadcast %33 : vector<16x1xf32> to vector<16x64xf32>
    %42 = arith.subf %3, %41 : vector<16x64xf32>
    %cst_21 = arith.constant 9.99999974E-6 : f32
    %43 = vector.broadcast %cst_21 : f32 to vector<16x1xf32>
    %44 = arith.addf %40, %43 : vector<16x1xf32>
    %45 = math.rsqrt %44 : vector<16x1xf32>
    %46 = vector.broadcast %45 : vector<16x1xf32> to vector<16x64xf32>
    %47 = arith.mulf %42, %46 : vector<16x64xf32>
    %48 = vector.broadcast %28 : vector<1x64xf32> to vector<16x64xf32>
    %49 = arith.mulf %47, %48 : vector<16x64xf32>
    %50 = vector.broadcast %29 : vector<1x64xf32> to vector<16x64xf32>
    %51 = arith.addf %49, %50 : vector<16x64xf32>
    %c0_22 = arith.constant 0 : index
    %c0_23 = arith.constant 0 : index
    %52 = vector.load %arg8[%c0_22, %c0_23] : memref<64x128xf32, #tpu.memory_space<vmem>>, vector<64x128xf32>
    %cst_24 = arith.constant dense<0.000000e+00> : vector<32x128xf32>
    %53 = tpu.matmul %27, %52, %cst_24 {dimension_numbers = #tpu.dot_dimension_numbers<[1], [0], [0], [1], [0, 0, 1, 1], [], []>} : vector<32x64xf32>, vector<64x128xf32>, vector<32x128xf32> -> vector<32x128xf32>
    %c0_25 = arith.constant 0 : index
    %c0_26 = arith.constant 0 : index
    %54 = vector.load %arg7[%c0_25, %c0_26] : memref<64x192xf32, #tpu.memory_space<vmem>>, vector<64x192xf32>
    %cst_27 = arith.constant dense<0.000000e+00> : vector<16x192xf32>
    %55 = tpu.matmul %51, %54, %cst_27 {dimension_numbers = #tpu.dot_dimension_numbers<[1], [0], [0], [1], [0, 0, 1, 1], [], []>} : vector<16x64xf32>, vector<64x192xf32>, vector<16x192xf32> -> vector<16x192xf32>
    %56 = vector.extract_strided_slice %53 {offsets = [0, 0], sizes = [32, 64], strides = [1, 1]} : vector<32x128xf32> to vector<32x64xf32>
    %57 = vector.shape_cast %56 : vector<32x64xf32> to vector<2x16x64xf32>
    %58 = vector.extract_strided_slice %53 {offsets = [0, 64], sizes = [32, 64], strides = [1, 1]} : vector<32x128xf32> to vector<32x64xf32>
    %59 = vector.shape_cast %58 : vector<32x64xf32> to vector<2x16x64xf32>
    %60 = vector.extract_strided_slice %55 {offsets = [0, 0], sizes = [16, 64], strides = [1, 1]} : vector<16x192xf32> to vector<16x64xf32>
    %61 = vector.shape_cast %60 : vector<16x64xf32> to vector<2x8x64xf32>
    %62 = vector.extract_strided_slice %55 {offsets = [0, 64], sizes = [16, 64], strides = [1, 1]} : vector<16x192xf32> to vector<16x64xf32>
    %63 = vector.shape_cast %62 : vector<16x64xf32> to vector<2x8x64xf32>
    %64 = vector.extract_strided_slice %55 {offsets = [0, 128], sizes = [16, 64], strides = [1, 1]} : vector<16x192xf32> to vector<16x64xf32>
    %65 = vector.shape_cast %64 : vector<16x64xf32> to vector<2x8x64xf32>
    %66 = vector.extract_strided_slice %61 {offsets = [0, 0, 0], sizes = [2, 8, 16], strides = [1, 1, 1]} : vector<2x8x64xf32> to vector<2x8x16xf32>
    %67 = vector.extract_strided_slice %57 {offsets = [0, 0, 0], sizes = [2, 16, 16], strides = [1, 1, 1]} : vector<2x16x64xf32> to vector<2x16x16xf32>
    "tpu.trace_start"() <{level = 10 : i32, message = "bqd,bkd->bqk"}> : () -> ()
    %cst_28 = arith.constant dense<0.000000e+00> : vector<2x8x16xf32>
    %68 = tpu.matmul %66, %67, %cst_28 {dimension_numbers = #tpu.dot_dimension_numbers<[2], [2], [1], [1], [0, 0, 0, 1, 1, 1], [0], [0]>} : vector<2x8x16xf32>, vector<2x16x16xf32>, vector<2x8x16xf32> -> vector<2x8x16xf32>
    "tpu.trace_stop"() : () -> ()
    %69 = vector.extract_strided_slice %63 {offsets = [0, 0, 0], sizes = [2, 8, 16], strides = [1, 1, 1]} : vector<2x8x64xf32> to vector<2x8x16xf32>
    "tpu.trace_start"() <{level = 10 : i32, message = "bqd,bkd->bqk"}> : () -> ()
    %cst_29 = arith.constant dense<0.000000e+00> : vector<2x8x8xf32>
    %70 = tpu.matmul %66, %69, %cst_29 {dimension_numbers = #tpu.dot_dimension_numbers<[2], [2], [1], [1], [0, 0, 0, 1, 1, 1], [0], [0]>} : vector<2x8x16xf32>, vector<2x8x16xf32>, vector<2x8x8xf32> -> vector<2x8x8xf32>
    "tpu.trace_stop"() : () -> ()
    %cst_30 = arith.constant dense<0xFF800000> : vector<2x8xf32>
    %71 = vector.multi_reduction <maximumf>, %68, %cst_30 [2] : vector<2x8x16xf32> to vector<2x8xf32>
    %72 = vector.shape_cast %71 : vector<2x8xf32> to vector<2x8x1xf32>
    %cst_31 = arith.constant dense<0xFF800000> : vector<2x8xf32>
    %73 = vector.multi_reduction <maximumf>, %70, %cst_31 [2] : vector<2x8x8xf32> to vector<2x8xf32>
    %74 = vector.shape_cast %73 : vector<2x8xf32> to vector<2x8x1xf32>
    %75 = arith.maximumf %72, %74 : vector<2x8x1xf32>
    %76 = vector.broadcast %75 : vector<2x8x1xf32> to vector<2x8x16xf32>
    %77 = arith.subf %68, %76 : vector<2x8x16xf32>
    %78 = math.exp %77 : vector<2x8x16xf32>
    %79 = vector.broadcast %75 : vector<2x8x1xf32> to vector<2x8x8xf32>
    %80 = arith.subf %70, %79 : vector<2x8x8xf32>
    %81 = math.exp %80 : vector<2x8x8xf32>
    %cst_32 = arith.constant dense<0.000000e+00> : vector<2x8xf32>
    %82 = vector.multi_reduction <add>, %78, %cst_32 [2] : vector<2x8x16xf32> to vector<2x8xf32>
    %83 = vector.shape_cast %82 : vector<2x8xf32> to vector<2x8x1xf32>
    %cst_33 = arith.constant dense<0.000000e+00> : vector<2x8xf32>
    %84 = vector.multi_reduction <add>, %81, %cst_33 [2] : vector<2x8x8xf32> to vector<2x8xf32>
    %85 = vector.shape_cast %84 : vector<2x8xf32> to vector<2x8x1xf32>
    %86 = arith.addf %83, %85 : vector<2x8x1xf32>
    %87 = tpu.reciprocal %86 : vector<2x8x1xf32> -> vector<2x8x1xf32>
    %88 = vector.extract_strided_slice %59 {offsets = [0, 0, 0], sizes = [2, 16, 16], strides = [1, 1, 1]} : vector<2x16x64xf32> to vector<2x16x16xf32>
    "tpu.trace_start"() <{level = 10 : i32, message = "bqk,bkd->bqd"}> : () -> ()
    %cst_34 = arith.constant dense<0.000000e+00> : vector<2x8x16xf32>
    %89 = tpu.matmul %78, %88, %cst_34 {dimension_numbers = #tpu.dot_dimension_numbers<[2], [1], [1], [2], [0, 0, 0, 1, 1, 2], [0], [0]>} : vector<2x8x16xf32>, vector<2x16x16xf32>, vector<2x8x16xf32> -> vector<2x8x16xf32>
    "tpu.trace_stop"() : () -> ()
    %90 = vector.extract_strided_slice %65 {offsets = [0, 0, 0], sizes = [2, 8, 16], strides = [1, 1, 1]} : vector<2x8x64xf32> to vector<2x8x16xf32>
    "tpu.trace_start"() <{level = 10 : i32, message = "bqk,bkd->bqd"}> : () -> ()
    %cst_35 = arith.constant dense<0.000000e+00> : vector<2x8x16xf32>
    %91 = tpu.matmul %81, %90, %cst_35 {dimension_numbers = #tpu.dot_dimension_numbers<[2], [1], [1], [2], [0, 0, 0, 1, 1, 2], [0], [0]>} : vector<2x8x8xf32>, vector<2x8x16xf32>, vector<2x8x16xf32> -> vector<2x8x16xf32>
    "tpu.trace_stop"() : () -> ()
    %92 = arith.addf %89, %91 : vector<2x8x16xf32>
    %93 = vector.broadcast %87 : vector<2x8x1xf32> to vector<2x8x16xf32>
    %94 = arith.mulf %92, %93 : vector<2x8x16xf32>
    %c0_36 = arith.constant 0 : index
    %c0_37 = arith.constant 0 : index
    %c0_38 = arith.constant 0 : index
    %95 = vector.load %arg15[%c0_36, %c0_37, %c0_38] : memref<2x8x64xf32, #tpu.memory_space<vmem>>, vector<2x8x16xf32>
    tpu.vector_store %arg15[%c0_36, %c0_37, %c0_38], %94 {strides = array<i32>} : memref<2x8x64xf32, #tpu.memory_space<vmem>>, vector<2x8x16xf32>,
    %96 = vector.extract_strided_slice %61 {offsets = [0, 0, 16], sizes = [2, 8, 16], strides = [1, 1, 1]} : vector<2x8x64xf32> to vector<2x8x16xf32>
    %97 = vector.extract_strided_slice %57 {offsets = [0, 0, 16], sizes = [2, 16, 16], strides = [1, 1, 1]} : vector<2x16x64xf32> to vector<2x16x16xf32>
    "tpu.trace_start"() <{level = 10 : i32, message = "bqd,bkd->bqk"}> : () -> ()
    %cst_39 = arith.constant dense<0.000000e+00> : vector<2x8x16xf32>
    %98 = tpu.matmul %96, %97, %cst_39 {dimension_numbers = #tpu.dot_dimension_numbers<[2], [2], [1], [1], [0, 0, 0, 1, 1, 1], [0], [0]>} : vector<2x8x16xf32>, vector<2x16x16xf32>, vector<2x8x16xf32> -> vector<2x8x16xf32>
    "tpu.trace_stop"() : () -> ()
    %99 = vector.extract_strided_slice %63 {offsets = [0, 0, 16], sizes = [2, 8, 16], strides = [1, 1, 1]} : vector<2x8x64xf32> to vector<2x8x16xf32>
    "tpu.trace_start"() <{level = 10 : i32, message = "bqd,bkd->bqk"}> : () -> ()
    %cst_40 = arith.constant dense<0.000000e+00> : vector<2x8x8xf32>
    %100 = tpu.matmul %96, %99, %cst_40 {dimension_numbers = #tpu.dot_dimension_numbers<[2], [2], [1], [1], [0, 0, 0, 1, 1, 1], [0], [0]>} : vector<2x8x16xf32>, vector<2x8x16xf32>, vector<2x8x8xf32> -> vector<2x8x8xf32>
    "tpu.trace_stop"() : () -> ()
    %cst_41 = arith.constant dense<0xFF800000> : vector<2x8xf32>
    %101 = vector.multi_reduction <maximumf>, %98, %cst_41 [2] : vector<2x8x16xf32> to vector<2x8xf32>
    %102 = vector.shape_cast %101 : vector<2x8xf32> to vector<2x8x1xf32>
    %cst_42 = arith.constant dense<0xFF800000> : vector<2x8xf32>
    %103 = vector.multi_reduction <maximumf>, %100, %cst_42 [2] : vector<2x8x8xf32> to vector<2x8xf32>
    %104 = vector.shape_cast %103 : vector<2x8xf32> to vector<2x8x1xf32>
    %105 = arith.maximumf %102, %104 : vector<2x8x1xf32>
    %106 = vector.broadcast %105 : vector<2x8x1xf32> to vector<2x8x16xf32>
    %107 = arith.subf %98, %106 : vector<2x8x16xf32>
    %108 = math.exp %107 : vector<2x8x16xf32>
    %109 = vector.broadcast %105 : vector<2x8x1xf32> to vector<2x8x8xf32>
    %110 = arith.subf %100, %109 : vector<2x8x8xf32>
    %111 = math.exp %110 : vector<2x8x8xf32>
    %cst_43 = arith.constant dense<0.000000e+00> : vector<2x8xf32>
    %112 = vector.multi_reduction <add>, %108, %cst_43 [2] : vector<2x8x16xf32> to vector<2x8xf32>
    %113 = vector.shape_cast %112 : vector<2x8xf32> to vector<2x8x1xf32>
    %cst_44 = arith.constant dense<0.000000e+00> : vector<2x8xf32>
    %114 = vector.multi_reduction <add>, %111, %cst_44 [2] : vector<2x8x8xf32> to vector<2x8xf32>
    %115 = vector.shape_cast %114 : vector<2x8xf32> to vector<2x8x1xf32>
    %116 = arith.addf %113, %115 : vector<2x8x1xf32>
    %117 = tpu.reciprocal %116 : vector<2x8x1xf32> -> vector<2x8x1xf32>
    %118 = vector.extract_strided_slice %59 {offsets = [0, 0, 16], sizes = [2, 16, 16], strides = [1, 1, 1]} : vector<2x16x64xf32> to vector<2x16x16xf32>
    "tpu.trace_start"() <{level = 10 : i32, message = "bqk,bkd->bqd"}> : () -> ()
    %cst_45 = arith.constant dense<0.000000e+00> : vector<2x8x16xf32>
    %119 = tpu.matmul %108, %118, %cst_45 {dimension_numbers = #tpu.dot_dimension_numbers<[2], [1], [1], [2], [0, 0, 0, 1, 1, 2], [0], [0]>} : vector<2x8x16xf32>, vector<2x16x16xf32>, vector<2x8x16xf32> -> vector<2x8x16xf32>
    "tpu.trace_stop"() : () -> ()
    %120 = vector.extract_strided_slice %65 {offsets = [0, 0, 16], sizes = [2, 8, 16], strides = [1, 1, 1]} : vector<2x8x64xf32> to vector<2x8x16xf32>
    "tpu.trace_start"() <{level = 10 : i32, message = "bqk,bkd->bqd"}> : () -> ()
    %cst_46 = arith.constant dense<0.000000e+00> : vector<2x8x16xf32>
    %121 = tpu.matmul %111, %120, %cst_46 {dimension_numbers = #tpu.dot_dimension_numbers<[2], [1], [1], [2], [0, 0, 0, 1, 1, 2], [0], [0]>} : vector<2x8x8xf32>, vector<2x8x16xf32>, vector<2x8x16xf32> -> vector<2x8x16xf32>
    "tpu.trace_stop"() : () -> ()
    %122 = arith.addf %119, %121 : vector<2x8x16xf32>
    %123 = vector.broadcast %117 : vector<2x8x1xf32> to vector<2x8x16xf32>
    %124 = arith.mulf %122, %123 : vector<2x8x16xf32>
    %c0_47 = arith.constant 0 : index
    %c0_48 = arith.constant 0 : index
    %c16 = arith.constant 16 : index
    %125 = vector.load %arg15[%c0_47, %c0_48, %c16] : memref<2x8x64xf32, #tpu.memory_space<vmem>>, vector<2x8x16xf32>
    tpu.vector_store %arg15[%c0_47, %c0_48, %c16], %124 {strides = array<i32>} : memref<2x8x64xf32, #tpu.memory_space<vmem>>, vector<2x8x16xf32>,
    %126 = vector.extract_strided_slice %61 {offsets = [0, 0, 32], sizes = [2, 8, 16], strides = [1, 1, 1]} : vector<2x8x64xf32> to vector<2x8x16xf32>
    %127 = vector.extract_strided_slice %57 {offsets = [0, 0, 32], sizes = [2, 16, 16], strides = [1, 1, 1]} : vector<2x16x64xf32> to vector<2x16x16xf32>
    "tpu.trace_start"() <{level = 10 : i32, message = "bqd,bkd->bqk"}> : () -> ()
    %cst_49 = arith.constant dense<0.000000e+00> : vector<2x8x16xf32>
    %128 = tpu.matmul %126, %127, %cst_49 {dimension_numbers = #tpu.dot_dimension_numbers<[2], [2], [1], [1], [0, 0, 0, 1, 1, 1], [0], [0]>} : vector<2x8x16xf32>, vector<2x16x16xf32>, vector<2x8x16xf32> -> vector<2x8x16xf32>
    "tpu.trace_stop"() : () -> ()
    %129 = vector.extract_strided_slice %63 {offsets = [0, 0, 32], sizes = [2, 8, 16], strides = [1, 1, 1]} : vector<2x8x64xf32> to vector<2x8x16xf32>
    "tpu.trace_start"() <{level = 10 : i32, message = "bqd,bkd->bqk"}> : () -> ()
    %cst_50 = arith.constant dense<0.000000e+00> : vector<2x8x8xf32>
    %130 = tpu.matmul %126, %129, %cst_50 {dimension_numbers = #tpu.dot_dimension_numbers<[2], [2], [1], [1], [0, 0, 0, 1, 1, 1], [0], [0]>} : vector<2x8x16xf32>, vector<2x8x16xf32>, vector<2x8x8xf32> -> vector<2x8x8xf32>
    "tpu.trace_stop"() : () -> ()
    %cst_51 = arith.constant dense<0xFF800000> : vector<2x8xf32>
    %131 = vector.multi_reduction <maximumf>, %128, %cst_51 [2] : vector<2x8x16xf32> to vector<2x8xf32>
    %132 = vector.shape_cast %131 : vector<2x8xf32> to vector<2x8x1xf32>
    %cst_52 = arith.constant dense<0xFF800000> : vector<2x8xf32>
    %133 = vector.multi_reduction <maximumf>, %130, %cst_52 [2] : vector<2x8x8xf32> to vector<2x8xf32>
    %134 = vector.shape_cast %133 : vector<2x8xf32> to vector<2x8x1xf32>
    %135 = arith.maximumf %132, %134 : vector<2x8x1xf32>
    %136 = vector.broadcast %135 : vector<2x8x1xf32> to vector<2x8x16xf32>
    %137 = arith.subf %128, %136 : vector<2x8x16xf32>
    %138 = math.exp %137 : vector<2x8x16xf32>
    %139 = vector.broadcast %135 : vector<2x8x1xf32> to vector<2x8x8xf32>
    %140 = arith.subf %130, %139 : vector<2x8x8xf32>
    %141 = math.exp %140 : vector<2x8x8xf32>
    %cst_53 = arith.constant dense<0.000000e+00> : vector<2x8xf32>
    %142 = vector.multi_reduction <add>, %138, %cst_53 [2] : vector<2x8x16xf32> to vector<2x8xf32>
    %143 = vector.shape_cast %142 : vector<2x8xf32> to vector<2x8x1xf32>
    %cst_54 = arith.constant dense<0.000000e+00> : vector<2x8xf32>
    %144 = vector.multi_reduction <add>, %141, %cst_54 [2] : vector<2x8x8xf32> to vector<2x8xf32>
    %145 = vector.shape_cast %144 : vector<2x8xf32> to vector<2x8x1xf32>
    %146 = arith.addf %143, %145 : vector<2x8x1xf32>
    %147 = tpu.reciprocal %146 : vector<2x8x1xf32> -> vector<2x8x1xf32>
    %148 = vector.extract_strided_slice %59 {offsets = [0, 0, 32], sizes = [2, 16, 16], strides = [1, 1, 1]} : vector<2x16x64xf32> to vector<2x16x16xf32>
    "tpu.trace_start"() <{level = 10 : i32, message = "bqk,bkd->bqd"}> : () -> ()
    %cst_55 = arith.constant dense<0.000000e+00> : vector<2x8x16xf32>
    %149 = tpu.matmul %138, %148, %cst_55 {dimension_numbers = #tpu.dot_dimension_numbers<[2], [1], [1], [2], [0, 0, 0, 1, 1, 2], [0], [0]>} : vector<2x8x16xf32>, vector<2x16x16xf32>, vector<2x8x16xf32> -> vector<2x8x16xf32>
    "tpu.trace_stop"() : () -> ()
    %150 = vector.extract_strided_slice %65 {offsets = [0, 0, 32], sizes = [2, 8, 16], strides = [1, 1, 1]} : vector<2x8x64xf32> to vector<2x8x16xf32>
    "tpu.trace_start"() <{level = 10 : i32, message = "bqk,bkd->bqd"}> : () -> ()
    %cst_56 = arith.constant dense<0.000000e+00> : vector<2x8x16xf32>
    %151 = tpu.matmul %141, %150, %cst_56 {dimension_numbers = #tpu.dot_dimension_numbers<[2], [1], [1], [2], [0, 0, 0, 1, 1, 2], [0], [0]>} : vector<2x8x8xf32>, vector<2x8x16xf32>, vector<2x8x16xf32> -> vector<2x8x16xf32>
    "tpu.trace_stop"() : () -> ()
    %152 = arith.addf %149, %151 : vector<2x8x16xf32>
    %153 = vector.broadcast %147 : vector<2x8x1xf32> to vector<2x8x16xf32>
    %154 = arith.mulf %152, %153 : vector<2x8x16xf32>
    %c0_57 = arith.constant 0 : index
    %c0_58 = arith.constant 0 : index
    %c32 = arith.constant 32 : index
    %155 = vector.load %arg15[%c0_57, %c0_58, %c32] : memref<2x8x64xf32, #tpu.memory_space<vmem>>, vector<2x8x16xf32>
    tpu.vector_store %arg15[%c0_57, %c0_58, %c32], %154 {strides = array<i32>} : memref<2x8x64xf32, #tpu.memory_space<vmem>>, vector<2x8x16xf32>,
    %156 = vector.extract_strided_slice %61 {offsets = [0, 0, 48], sizes = [2, 8, 16], strides = [1, 1, 1]} : vector<2x8x64xf32> to vector<2x8x16xf32>
    %157 = vector.extract_strided_slice %57 {offsets = [0, 0, 48], sizes = [2, 16, 16], strides = [1, 1, 1]} : vector<2x16x64xf32> to vector<2x16x16xf32>
    "tpu.trace_start"() <{level = 10 : i32, message = "bqd,bkd->bqk"}> : () -> ()
    %cst_59 = arith.constant dense<0.000000e+00> : vector<2x8x16xf32>
    %158 = tpu.matmul %156, %157, %cst_59 {dimension_numbers = #tpu.dot_dimension_numbers<[2], [2], [1], [1], [0, 0, 0, 1, 1, 1], [0], [0]>} : vector<2x8x16xf32>, vector<2x16x16xf32>, vector<2x8x16xf32> -> vector<2x8x16xf32>
    "tpu.trace_stop"() : () -> ()
    %159 = vector.extract_strided_slice %63 {offsets = [0, 0, 48], sizes = [2, 8, 16], strides = [1, 1, 1]} : vector<2x8x64xf32> to vector<2x8x16xf32>
    "tpu.trace_start"() <{level = 10 : i32, message = "bqd,bkd->bqk"}> : () -> ()
    %cst_60 = arith.constant dense<0.000000e+00> : vector<2x8x8xf32>
    %160 = tpu.matmul %156, %159, %cst_60 {dimension_numbers = #tpu.dot_dimension_numbers<[2], [2], [1], [1], [0, 0, 0, 1, 1, 1], [0], [0]>} : vector<2x8x16xf32>, vector<2x8x16xf32>, vector<2x8x8xf32> -> vector<2x8x8xf32>
    "tpu.trace_stop"() : () -> ()
    %cst_61 = arith.constant dense<0xFF800000> : vector<2x8xf32>
    %161 = vector.multi_reduction <maximumf>, %158, %cst_61 [2] : vector<2x8x16xf32> to vector<2x8xf32>
    %162 = vector.shape_cast %161 : vector<2x8xf32> to vector<2x8x1xf32>
    %cst_62 = arith.constant dense<0xFF800000> : vector<2x8xf32>
    %163 = vector.multi_reduction <maximumf>, %160, %cst_62 [2] : vector<2x8x8xf32> to vector<2x8xf32>
    %164 = vector.shape_cast %163 : vector<2x8xf32> to vector<2x8x1xf32>
    %165 = arith.maximumf %162, %164 : vector<2x8x1xf32>
    %166 = vector.broadcast %165 : vector<2x8x1xf32> to vector<2x8x16xf32>
    %167 = arith.subf %158, %166 : vector<2x8x16xf32>
    %168 = math.exp %167 : vector<2x8x16xf32>
    %169 = vector.broadcast %165 : vector<2x8x1xf32> to vector<2x8x8xf32>
    %170 = arith.subf %160, %169 : vector<2x8x8xf32>
    %171 = math.exp %170 : vector<2x8x8xf32>
    %cst_63 = arith.constant dense<0.000000e+00> : vector<2x8xf32>
    %172 = vector.multi_reduction <add>, %168, %cst_63 [2] : vector<2x8x16xf32> to vector<2x8xf32>
    %173 = vector.shape_cast %172 : vector<2x8xf32> to vector<2x8x1xf32>
    %cst_64 = arith.constant dense<0.000000e+00> : vector<2x8xf32>
    %174 = vector.multi_reduction <add>, %171, %cst_64 [2] : vector<2x8x8xf32> to vector<2x8xf32>
    %175 = vector.shape_cast %174 : vector<2x8xf32> to vector<2x8x1xf32>
    %176 = arith.addf %173, %175 : vector<2x8x1xf32>
    %177 = tpu.reciprocal %176 : vector<2x8x1xf32> -> vector<2x8x1xf32>
    %178 = vector.extract_strided_slice %59 {offsets = [0, 0, 48], sizes = [2, 16, 16], strides = [1, 1, 1]} : vector<2x16x64xf32> to vector<2x16x16xf32>
    "tpu.trace_start"() <{level = 10 : i32, message = "bqk,bkd->bqd"}> : () -> ()
    %cst_65 = arith.constant dense<0.000000e+00> : vector<2x8x16xf32>
    %179 = tpu.matmul %168, %178, %cst_65 {dimension_numbers = #tpu.dot_dimension_numbers<[2], [1], [1], [2], [0, 0, 0, 1, 1, 2], [0], [0]>} : vector<2x8x16xf32>, vector<2x16x16xf32>, vector<2x8x16xf32> -> vector<2x8x16xf32>
    "tpu.trace_stop"() : () -> ()
    %180 = vector.extract_strided_slice %65 {offsets = [0, 0, 48], sizes = [2, 8, 16], strides = [1, 1, 1]} : vector<2x8x64xf32> to vector<2x8x16xf32>
    "tpu.trace_start"() <{level = 10 : i32, message = "bqk,bkd->bqd"}> : () -> ()
    %cst_66 = arith.constant dense<0.000000e+00> : vector<2x8x16xf32>
    %181 = tpu.matmul %171, %180, %cst_66 {dimension_numbers = #tpu.dot_dimension_numbers<[2], [1], [1], [2], [0, 0, 0, 1, 1, 2], [0], [0]>} : vector<2x8x8xf32>, vector<2x8x16xf32>, vector<2x8x16xf32> -> vector<2x8x16xf32>
    "tpu.trace_stop"() : () -> ()
    %182 = arith.addf %179, %181 : vector<2x8x16xf32>
    %183 = vector.broadcast %177 : vector<2x8x1xf32> to vector<2x8x16xf32>
    %184 = arith.mulf %182, %183 : vector<2x8x16xf32>
    %c0_67 = arith.constant 0 : index
    %c0_68 = arith.constant 0 : index
    %c48 = arith.constant 48 : index
    %185 = vector.load %arg15[%c0_67, %c0_68, %c48] : memref<2x8x64xf32, #tpu.memory_space<vmem>>, vector<2x8x16xf32>
    tpu.vector_store %arg15[%c0_67, %c0_68, %c48], %184 {strides = array<i32>} : memref<2x8x64xf32, #tpu.memory_space<vmem>>, vector<2x8x16xf32>,
    %c0_69 = arith.constant 0 : index
    %c0_70 = arith.constant 0 : index
    %c0_71 = arith.constant 0 : index
    %186 = vector.load %arg15[%c0_69, %c0_70, %c0_71] : memref<2x8x64xf32, #tpu.memory_space<vmem>>, vector<2x8x64xf32>
    %187 = vector.shape_cast %186 : vector<2x8x64xf32> to vector<16x64xf32>
    %c0_72 = arith.constant 0 : index
    %c0_73 = arith.constant 0 : index
    %188 = vector.load %arg9[%c0_72, %c0_73] : memref<64x64xf32, #tpu.memory_space<vmem>>, vector<64x64xf32>
    %cst_74 = arith.constant dense<0.000000e+00> : vector<16x64xf32>
    %189 = tpu.matmul %187, %188, %cst_74 {dimension_numbers = #tpu.dot_dimension_numbers<[1], [0], [0], [1], [0, 0, 1, 1], [], []>} : vector<16x64xf32>, vector<64x64xf32>, vector<16x64xf32> -> vector<16x64xf32>
    %190 = arith.addf %3, %189 : vector<16x64xf32>
    %c0_75 = arith.constant 0 : index
    %c0_76 = arith.constant 0 : index
    %191 = vector.load %arg10[%c0_75, %c0_76] : memref<1x64xf32, #tpu.memory_space<vmem>>, vector<1x64xf32>
    %c0_77 = arith.constant 0 : index
    %c0_78 = arith.constant 0 : index
    %192 = vector.load %arg11[%c0_77, %c0_78] : memref<1x64xf32, #tpu.memory_space<vmem>>, vector<1x64xf32>
    %cst_79 = arith.constant dense<0.000000e+00> : vector<16xf32>
    %193 = vector.multi_reduction <add>, %190, %cst_79 [1] : vector<16x64xf32> to vector<16xf32>
    %194 = vector.shape_cast %193 : vector<16xf32> to vector<16x1xf32>
    %cst_80 = arith.constant 6.400000e+01 : f32
    %195 = vector.broadcast %cst_80 : f32 to vector<16x1xf32>
    %196 = arith.divf %194, %195 : vector<16x1xf32>
    %197 = vector.broadcast %196 : vector<16x1xf32> to vector<16x64xf32>
    %198 = arith.subf %190, %197 : vector<16x64xf32>
    %199 = arith.mulf %198, %198 : vector<16x64xf32>
    %cst_81 = arith.constant dense<0.000000e+00> : vector<16xf32>
    %200 = vector.multi_reduction <add>, %199, %cst_81 [1] : vector<16x64xf32> to vector<16xf32>
    %201 = vector.shape_cast %200 : vector<16xf32> to vector<16x1xf32>
    %cst_82 = arith.constant 6.400000e+01 : f32
    %202 = vector.broadcast %cst_82 : f32 to vector<16x1xf32>
    %203 = arith.divf %201, %202 : vector<16x1xf32>
    %204 = vector.broadcast %196 : vector<16x1xf32> to vector<16x64xf32>
    %205 = arith.subf %190, %204 : vector<16x64xf32>
    %cst_83 = arith.constant 9.99999974E-6 : f32
    %206 = vector.broadcast %cst_83 : f32 to vector<16x1xf32>
    %207 = arith.addf %203, %206 : vector<16x1xf32>
    %208 = math.rsqrt %207 : vector<16x1xf32>
    %209 = vector.broadcast %208 : vector<16x1xf32> to vector<16x64xf32>
    %210 = arith.mulf %205, %209 : vector<16x64xf32>
    %211 = vector.broadcast %191 : vector<1x64xf32> to vector<16x64xf32>
    %212 = arith.mulf %210, %211 : vector<16x64xf32>
    %213 = vector.broadcast %192 : vector<1x64xf32> to vector<16x64xf32>
    %214 = arith.addf %212, %213 : vector<16x64xf32>
    %c0_84 = arith.constant 0 : index
    %c0_85 = arith.constant 0 : index
    %215 = vector.load %arg12[%c0_84, %c0_85] : memref<64x128xf32, #tpu.memory_space<vmem>>, vector<64x128xf32>
    %cst_86 = arith.constant dense<0.000000e+00> : vector<16x128xf32>
    %216 = tpu.matmul %214, %215, %cst_86 {dimension_numbers = #tpu.dot_dimension_numbers<[1], [0], [0], [1], [0, 0, 1, 1], [], []>} : vector<16x64xf32>, vector<64x128xf32>, vector<16x128xf32> -> vector<16x128xf32>
    %cst_87 = arith.constant 5.000000e-01 : f32
    %217 = vector.broadcast %cst_87 : f32 to vector<16x128xf32>
    %218 = arith.mulf %217, %216 : vector<16x128xf32>
    %cst_88 = arith.constant 4.471500e-02 : f32
    %219 = vector.broadcast %cst_88 : f32 to vector<16x128xf32>
    %220 = arith.mulf %219, %216 : vector<16x128xf32>
    %221 = arith.mulf %220, %216 : vector<16x128xf32>
    %222 = arith.mulf %221, %216 : vector<16x128xf32>
    %223 = arith.addf %216, %222 : vector<16x128xf32>
    %cst_89 = arith.constant 0.797884583 : f32
    %224 = vector.broadcast %cst_89 : f32 to vector<16x128xf32>
    %225 = arith.mulf %224, %223 : vector<16x128xf32>
    %226 = math.tanh %225 : vector<16x128xf32>
    %cst_90 = arith.constant 1.000000e+00 : f32
    %227 = vector.broadcast %cst_90 : f32 to vector<16x128xf32>
    %228 = arith.addf %227, %226 : vector<16x128xf32>
    %229 = arith.mulf %218, %228 : vector<16x128xf32>
    %c0_91 = arith.constant 0 : index
    %c0_92 = arith.constant 0 : index
    %230 = vector.load %arg13[%c0_91, %c0_92] : memref<128x64xf32, #tpu.memory_space<vmem>>, vector<128x64xf32>
    %cst_93 = arith.constant dense<0.000000e+00> : vector<16x64xf32>
    %231 = tpu.matmul %229, %230, %cst_93 {dimension_numbers = #tpu.dot_dimension_numbers<[1], [0], [0], [1], [0, 0, 1, 1], [], []>} : vector<16x128xf32>, vector<128x64xf32>, vector<16x64xf32> -> vector<16x64xf32>
    %232 = arith.addf %190, %231 : vector<16x64xf32>
    %233 = vector.shape_cast %232 : vector<16x64xf32> to vector<2x8x64xf32>
    %c0_94 = arith.constant 0 : index
    %c0_95 = arith.constant 0 : index
    %c0_96 = arith.constant 0 : index
    %234 = vector.load %arg14[%c0_94, %c0_95, %c0_96] : memref<2x8x64xf32, #tpu.memory_space<vmem>>, vector<2x8x64xf32>
    tpu.vector_store %arg14[%c0_94, %c0_95, %c0_96], %233 {strides = array<i32>} : memref<2x8x64xf32, #tpu.memory_space<vmem>>, vector<2x8x64xf32>,
    return
  }
  func.func @transform_0(%arg0: i32) -> (i32, i32, i32) {
    %c0_i32 = arith.constant 0 : i32
    %c0_i32_0 = arith.constant 0 : i32
    %c0_i32_1 = arith.constant 0 : i32
    return %arg0, %c0_i32, %c0_i32_0 : i32, i32, i32
  }
  func.func @transform_1(%arg0: i32) -> (i32, i32, i32) {
    %c0_i32 = arith.constant 0 : i32
    %c0_i32_0 = arith.constant 0 : i32
    %c0_i32_1 = arith.constant 0 : i32
    return %arg0, %c0_i32, %c0_i32_0 : i32, i32, i32
  }
  func.func @transform_2(%arg0: i32) -> (i32, i32) {
    %c0_i32 = arith.constant 0 : i32
    %c0_i32_0 = arith.constant 0 : i32
    %c0_i32_1 = arith.constant 0 : i32
    return %c0_i32, %c0_i32_0 : i32, i32
  }
  func.func @transform_3(%arg0: i32) -> (i32, i32) {
    %c0_i32 = arith.constant 0 : i32
    %c0_i32_0 = arith.constant 0 : i32
    %c0_i32_1 = arith.constant 0 : i32
    return %c0_i32, %c0_i32_0 : i32, i32
  }
  func.func @transform_4(%arg0: i32) -> (i32, i32) {
    %c0_i32 = arith.constant 0 : i32
    %c0_i32_0 = arith.constant 0 : i32
    %c0_i32_1 = arith.constant 0 : i32
    return %c0_i32, %c0_i32_0 : i32, i32
  }
  func.func @transform_5(%arg0: i32) -> (i32, i32) {
    %c0_i32 = arith.constant 0 : i32
    %c0_i32_0 = arith.constant 0 : i32
    %c0_i32_1 = arith.constant 0 : i32
    return %c0_i32, %c0_i32_0 : i32, i32
  }
  func.func @transform_6(%arg0: i32) -> (i32, i32) {
    %c0_i32 = arith.constant 0 : i32
    %c0_i32_0 = arith.constant 0 : i32
    %c0_i32_1 = arith.constant 0 : i32
    return %c0_i32, %c0_i32_0 : i32, i32
  }
  func.func @transform_7(%arg0: i32) -> (i32, i32) {
    %c0_i32 = arith.constant 0 : i32
    %c0_i32_0 = arith.constant 0 : i32
    %c0_i32_1 = arith.constant 0 : i32
    return %c0_i32, %c0_i32_0 : i32, i32
  }
  func.func @transform_8(%arg0: i32) -> (i32, i32) {
    %c0_i32 = arith.constant 0 : i32
    %c0_i32_0 = arith.constant 0 : i32
    %c0_i32_1 = arith.constant 0 : i32
    return %c0_i32, %c0_i32_0 : i32, i32
  }
  func.func @transform_9(%arg0: i32) -> (i32, i32) {
    %c0_i32 = arith.constant 0 : i32
    %c0_i32_0 = arith.constant 0 : i32
    %c0_i32_1 = arith.constant 0 : i32
    return %c0_i32, %c0_i32_0 : i32, i32
  }
  func.func @transform_10(%arg0: i32) -> (i32, i32) {
    %c0_i32 = arith.constant 0 : i32
    %c0_i32_0 = arith.constant 0 : i32
    %c0_i32_1 = arith.constant 0 : i32
    return %c0_i32, %c0_i32_0 : i32, i32
  }
  func.func @transform_11(%arg0: i32) -> (i32, i32) {
    %c0_i32 = arith.constant 0 : i32
    %c0_i32_0 = arith.constant 0 : i32
    %c0_i32_1 = arith.constant 0 : i32
    return %c0_i32, %c0_i32_0 : i32, i32
  }
  func.func @transform_12(%arg0: i32) -> (i32, i32) {
    %c0_i32 = arith.constant 0 : i32
    %c0_i32_0 = arith.constant 0 : i32
    %c0_i32_1 = arith.constant 0 : i32
    return %c0_i32, %c0_i32_0 : i32, i32
  }
  func.func @transform_13(%arg0: i32) -> (i32, i32, i32) {
    %c0_i32 = arith.constant 0 : i32
    %c0_i32_0 = arith.constant 0 : i32
    %c0_i32_1 = arith.constant 0 : i32
    return %arg0, %c0_i32, %c0_i32_0 : i32, i32, i32
  }
}

</mosaic_0001>

<bundles_post_ra>
// kernel: resampler_forward.4
= control target key start
LH: loop header
LB: loop body
LE: loop exit
PB: predicated region body
PF: predicated region fallthrough
CT: control target
= control target key end

     0   :  { %s445_s12 = smov 0   ;;  %s477_s0 = inlined_call_operand.vmem [shape: f32[4,16,32], index: 0, kind: input, shape index: {}]   ;;  %s478_s1 = inlined_call_operand.vmem [shape: f32[32,64], index: 1, kind: input, shape index: {}]   ;;  %s479_s2 = inlined_call_operand.vmem [shape: f32[1,64], index: 2, kind: input, shape index: {}]   ;;  %s480_s3 = inlined_call_operand.vmem [shape: f32[4,16,64], index: 3, kind: output, shape index: {}]  }
   0x1 LB: > { %s355_s13 = sadd.s32 4294967295, %s423_s12   ;;  %p359_p0 = scmp.ge.s32.totalorder %s423_s12, 1  ;;  %s423_s12 = sphi %s445_s12, %s13_s12  }
   0x2   : > { %p139_p1 = scmp.lt.s32.totalorder %s423_s12, 3 }
   0x4   : > { %p140_p2 = pnand %p359_p0, %p139_p1 }
   0x5   : > { %v183_v0 = vld [vmem:[%s478_s1] sm:$0xff] (!%p140_p2)  ;;  %v184_v1 = vld [vmem:[%s478_s1 + $0x8] sm:$0xff] (!%p140_p2)  ;;  %v185_v2 = vld [vmem:[%s478_s1 + $0x10] sm:$0xff] (!%p140_p2)  ;;  %s360_s20 = sshll.u32 (!%p140_p2), %s355_s13, 1  ;;  %vm194_vm0 = vcmask (!%p140_p2), 261120   ;;  %vm292_vm1 = vcmask (!%p140_p2), 523264  }
   0x6   : > { %143 = sbr.rel (%p140_p2) target bundleno = 234 (0xea), region = 32  ;;  %v397_v3 = vpack.c.bf16 (!%p140_p2), %v184_v1, %v183_v0  ;;  %v186_v4 = vld [vmem:[%s478_s1 + $0x18] sm:$0xff] (!%p140_p2)  ;;  %p166_p3 = scmp.lt.s32.totalorder (!%p140_p2), %s360_s20, 3  ;;  %v366_v10 = vld [vmem:[%s479_s2] ss:$0 sm:$0xff] (!%p140_p2) }
   0x7   : > { %v401_v5 = vpack.c.bf16 (!%p140_p2), %v186_v4, %v185_v2 }
   0x8   : > { %398 = vmatprep.subr.bf16.mxu0 (!%p140_p2), %v397_v3  ;;  %405 = vmatprep.subr.bf16.mxu1 (!%p140_p2), %v397_v3 }
   0x9   : > { %400 = vmatpush3.bf16.msra.mxu0 (!%p140_p2), %v397_v3  ;;  %407 = vmatpush3.bf16.msra.mxu1 (!%p140_p2), %v397_v3 }
   0xa   : > { %402 = vmatprep.subr.bf16.mxu0 (!%p140_p2), %v401_v5  ;;  %406 = vmatprep.subr.bf16.mxu1 (!%p140_p2), %v401_v5 }
   0xd   : > { %s482_s20 = smov (!%p166_p3, %s360_s20), 3  ;;  %404 = vmatpush3.bf16.msra.mxu0 %v401_v5  ;;  %408 = vmatpush3.bf16.msra.mxu1 %v401_v5 }
   0xe   : > { %s373_s23 = sshll.u32 %s482_s20, 4 }
   0xf   : > { %s170_s26 = scalar_lea.vmem %s477_s0, %s373_s23  ;;  %s177_s4 = scalar_lea.vmem %s480_s3, %s373_s23 }
  0x10   : > { %v179_v6 = vld [vmem:[%s170_s26] sm:$0xff]  ;;  %v181_v7 = vld [vmem:[%s170_s26 + $0x10] sm:$0xff]  ;;  %v180_v8 = vld [vmem:[%s170_s26 + $0x8] sm:$0xff] }
  0x11   : > { %v182_v9 = vld [vmem:[%s170_s26 + $0x18] sm:$0xff]  ;;  %391 = vmatprep.mubr.msk.f32.mxu0 %vm194_vm0, %v179_v6  ;;  %394 = vmatprep.mubr.msk.f32.mxu1 %vm194_vm0, %v181_v7 }
  0x12   : > { %392 = vmatmul.mubr.msk.f32.vlgmr.msra.gmra.mrb[0].mxu0 %vm194_vm0, %v180_v8  ;;  %395 = vmatmul.mubr.msk.f32.vlgmr.msra.gmra.mrb[0].mxu1 %vm194_vm0, %v182_v9 }
  0xe5   : > { %v393_v11 = vpop.f32.mrb[0].mxu0  ;;  %v396_v12 = vpop.f32.mrb[0].mxu1 }
  0xe6   : > { %v279_v13 = vadd.f32 %v393_v11, %v366_v10  ;;  %v289_v14 = vadd.f32 %v396_v12, %v366_v10  ;;  %v273_v15 = vpop.f32.mrb[1].mxu0  ;;  %v283_v16 = vpop.f32.mrb[1].mxu1 }
  0xe7   : > { %v274_v17 = vadd.f32 %v366_v10, %v273_v15  ;;  %v284_v18 = vadd.f32 %v366_v10, %v283_v16 }
  0xe8   : > { %294 = vst.msk [vmem:[%s177_s4 + $0x8] sm:$0xff] %vm292_vm1, %v279_v13  ;;  %296 = vst.msk [vmem:[%s177_s4 + $0x18] sm:$0xff] %vm292_vm1, %v289_v14 }
  0xe9   : > { %293 = vst.msk [vmem:[%s177_s4] sm:$0xff] %vm292_vm1, %v274_v17  ;;  %295 = vst.msk [vmem:[%s177_s4 + $0x10] sm:$0xff] %vm292_vm1, %v284_v18 }
  0xea PF: > { %s13_s12 = sadd.s32 1, %s423_s12  }
  0xeb   : > { %p10_p4 = scmp.ge.s32.totalorder %s13_s12, 4  }
  0xed   :  { %12 = sbr.rel (!%p10_p4) target bundleno = 1 (0x1), region = 62 }

// kernel: resampler_forward.7
= control target key start
LH: loop header
LB: loop body
LE: loop exit
PB: predicated region body
PF: predicated region fallthrough
CT: control target
= control target key end

     0   :  { %10 = vsyncpa [#allocation3], 0  ;;  %s796_s0 = inlined_call_operand.vmem [shape: f32[4,8,64], index: 0, kind: input, shape index: {}]   ;;  %s797_s1 = inlined_call_operand.vmem [shape: f32[64,64], index: 1, kind: input, shape index: {}]   ;;  %s798_s2 = inlined_call_operand.vmem [shape: f32[1,64], index: 2, kind: input, shape index: {}]   ;;  %s799_s3 = inlined_call_operand.vmem [shape: f32[1,64], index: 3, kind: input, shape index: {}]   ;;  %s800_s4 = inlined_call_operand.vmem [shape: f32[1,64], index: 4, kind: input, shape index: {}]   ;;  %s801_s5 = inlined_call_operand.hbm [shape: f32[4,8,64], index: 5, kind: output, shape index: {}]  }
   0x1   :  { %12 = vsyncpa [#allocation3 + $0x1], 0  ;;  %s653_s18 = smov 0   ;;  %s655_s19 = smov 0  }
   0x2   :  { %s657_s20 = smov 0   ;;  %s659_s21 = smov 0  }
   0x3 LB: > { %s674_s22 = sadd.s32 4294967295, %s618_s21   ;;  %s448_s23 = sadd.s32 4294967294, %s618_s21   ;;  %s618_s21 = sphi %s659_s21, %s807_s21   ;;  %s614_s20 = sphi %s657_s20, %s806_s20   ;;  %s610_s19 = sphi %s655_s19, %s805_s19   ;;  %s606_s18 = sphi %s653_s18, %s804_s18  }
   0x4   : > { %s678_s24 = sadd.s32 1, %s618_s21   ;;  %s135_s25 = sadd.s32 1, %s614_s20 }
   0x5   : > { %s132_s26 = ssub.s32 %s618_s21, %s678_s24  ;;  %p145_p0 = scmp.ne.s32.totalorder %s614_s20, %s610_s19 }
   0x6   : > { %p133_p1 = scmp.eq.s32.totalorder %s132_s26, 0  ;;  %p146_p2 = scmp.eq.s32.totalorder %s674_s22, 1 }
   0x7   : > { %p151_p3 = scmp.ne.s32.totalorder %s610_s19, %s606_s18  ;;  %p152_p4 = scmp.eq.s32.totalorder %s448_s23, 1 }
   0x8   : > { %s689_s27 = scalar_select %p133_p1, %s614_s20, %s135_s25  }
   0x9   : > { %p691_p5 = por %p146_p2, %p145_p0  ;;  %p695_p6 = por %p152_p4, %p151_p3 }
   0xa   : > { %p451_p7 = scmp.ge.s32.totalorder %s618_s21, 1  ;;  %p191_p8 = scmp.lt.s32.totalorder %s618_s21, 3 }
   0xc   : > { %p192_p9 = pnand %p451_p7, %p191_p8 }
   0xd   : > { %v228_v0 = vld [vmem:[%s797_s1] sm:$0xff] (!%p192_p9)  ;;  %v229_v1 = vld [vmem:[%s797_s1 + $0x8] sm:$0xff] (!%p192_p9)  ;;  %v230_v2 = vld [vmem:[%s797_s1 + $0x10] sm:$0xff] (!%p192_p9)  ;;  %s453_s11 = sshll.u32 (!%p192_p9), %s674_s22, 1  ;;  %vm243_vm0 = vcmask (!%p192_p9), 523264   ;;  %s216_s12 = sand.u32 (!%p192_p9), 1, %s610_s19  }
   0xe   : > { %195 = sbr.rel (%p192_p9) target bundleno = 579 (0x243), region = 40  ;;  %v495_v3 = vpack.c.bf16 (!%p192_p9), %v229_v1, %v228_v0  ;;  %v231_v4 = vld [vmem:[%s797_s1 + $0x18] sm:$0xff] (!%p192_p9)  ;;  %p220_p10 = scmp.lt.s32.totalorder (!%p192_p9), %s453_s11, 3  ;;  %v232_v6 = vld [vmem:[%s797_s1 + $0x20] sm:$0xff] (!%p192_p9)  ;;  %v233_v7 = vld [vmem:[%s797_s1 + $0x28] sm:$0xff] (!%p192_p9) }
   0xf   : > { %v499_v5 = vpack.c.bf16 (!%p192_p9), %v231_v4, %v230_v2  ;;  %v503_v8 = vpack.c.bf16 (!%p192_p9), %v233_v7, %v232_v6  ;;  %v234_v9 = vld [vmem:[%s797_s1 + $0x30] sm:$0xff] (!%p192_p9)  ;;  %v235_v10 = vld [vmem:[%s797_s1 + $0x38] sm:$0xff] (!%p192_p9)  ;;  %v455_v14 = vld [vmem:[%s798_s2] ss:$0 sm:$0xff] (!%p192_p9)  ;;  %s452_s15 = sshll.u32 (!%p192_p9), %s216_s12, 4  ;;  %s755_s8 = scalar_lea.sflag (!%p192_p9), [#allocation3], %s216_s12 }
  0x10   : > { %496 = vmatprep.subr.bf16.mxu0 (!%p192_p9), %v495_v3  ;;  %v507_v12 = vpack.c.bf16 (!%p192_p9), %v235_v10, %v234_v9  ;;  %v458_v38 = vld [vmem:[%s799_s3] ss:$0 sm:$0xff] (!%p192_p9)  ;;  %s218_s25 = scalar_lea.vmem (!%p192_p9), [#allocation2], %s452_s15 }
  0x11   : > { %498 = vmatpush3.bf16.msra.mxu0 (!%p192_p9), %v495_v3  ;;  %v459_v40 = vld [vmem:[%s800_s4] ss:$0 sm:$0xff] (!%p192_p9)  ;;  %s386_s26 = sshll.u32 (!%p192_p9), %s218_s25, 4  ;;  %s752_s26 = int_to_ptr.vmem [resolvable:$true] %s386_s26 }
  0x12   : > { %500 = vmatprep.subr.bf16.mxu0 (!%p192_p9), %v499_v5 }
  0x15   : > { %s809_s11 = smov (!%p220_p10, %s453_s11), 3  ;;  %502 = vmatpush3.bf16.msra.mxu0 %v499_v5 }
  0x16   : > { %s454_s23 = sshll.u32 %s809_s11, 3  ;;  %504 = vmatprep.subr.bf16.mxu0 %v503_v8 }
  0x17   : > { %s223_s9 = scalar_lea.vmem %s796_s0, %s454_s23  ;;  %s465_s23 = sshll.u32 %s674_s22, 8 }
  0x18   : > { %v226_v11 = vld [vmem:[%s223_s9] sm:$0xff]  ;;  %v227_v13 = vld [vmem:[%s223_s9 + $0x8] sm:$0xff]  ;;  %s750_s7 = scalar_lea.hbm %s801_s5, %s465_s23  ;;  %s556_s22 = scalar_lea.vmem %s752_s26, 256 }
  0x19   : > { %492 = vmatprep.mubr.msk.f32.mxu0 %vm243_vm0, %v226_v11  ;;  %506 = vmatpush3.bf16.msra.mxu0 %v503_v8  ;;  %p557_p11 = scmp.ne.s32.totalorder %s752_s26, %s556_s22  ;;  %s620_s9 = smov [#allocation2]  }
  0x1a   : > { %508 = vmatprep.subr.bf16.mxu0 %v507_v12  ;;  %s560_s10 = sshll.u32 %s620_s9, 4  ;;  %s561_s10 = int_to_ptr.vmem [resolvable:$false] %s560_s10 }
  0x1b   : > { %p558_p12 = pnand %p557_p11, %p691_p5  ;;  %s562_s11 = scalar_lea.vmem %s561_s10, 512 }
  0x1c   : > { %p563_p0 = scmp.lt.s32.totalorder %s752_s26, %s561_s10  ;;  %p564_p1 = scmp.lt.s32.totalorder %s562_s11, %s556_s22 }
  0x1d   : > { %510 = vmatpush3.bf16.msra.mxu0 %v507_v12  ;;  %p559_p13 = pneg %p558_p12 }
  0x1e   : > { %p565_p2 = por %p564_p1, %p563_p0 }
  0x20   : > { %493 = vmatmul.mubr.msk.f32.vlgmr.msra.gmra.mrb[0].mxu0 %vm243_vm0, %v227_v13  ;;  %p566_p3 = pnand %p565_p2, %p559_p13 }
  0xf3   : > { %v494_v15 = vpop.f32.mrb[0].mxu0 }
  0xf4   : > { %v316_v16 = vpop.f32.mrb[1].mxu0  ;;  %v322_v18 = vadd.f32 %v494_v15, %v455_v14 }
  0xf5   : > { %v317_v17 = vadd.f32 %v455_v14, %v316_v16 }
  0xf6   : > { %v330_v20 = vsel %vm243_vm0, %v322_v18, 0.0 }
  0xf7   : > { %v327_v19 = vsel %vm243_vm0, %v317_v17, 0.0 }
  0xf8   : > { %328 = vadd.xlane.f32.xlu0 %v327_v19 }
  0xfc   : > { %331 = vadd.xlane.f32.xlu0 %v330_v20 }
 0x185   : > { %v329_v21 = vpop.xlane.xlu0 %328 }
 0x186   : > { %v334_v22 = vmul.f32 0.015625, %v329_v21 }
 0x188   : > { %v336_v23 = vsub.f32 %v317_v17, %v334_v22 }
 0x189   : > { %v332_v24 = vpop.xlane.xlu0 %331 }
 0x18a   : > { %v335_v25 = vmul.f32 0.015625, %v332_v24  ;;  %v338_v26 = vmul.f32 %v336_v23, %v336_v23 }
 0x18c   : > { %v337_v27 = vsub.f32 %v322_v18, %v335_v25  ;;  %v340_v28 = vsel %vm243_vm0, %v338_v26, 0.0 }
 0x18d   : > { %341 = vadd.xlane.f32.xlu1 %v340_v28 }
 0x18e   : > { %v339_v29 = vmul.f32 %v337_v27, %v337_v27 }
 0x190   : > { %v343_v30 = vsel %vm243_vm0, %v339_v29, 0.0 }
 0x191   : > { %344 = vadd.xlane.f32.xlu1 %v343_v30 }
 0x21a   : > { %v342_v31 = vpop.xlane.xlu1 %341 }
 0x21b   : > { %v346_v32 = vmul.f32 0.015625, %v342_v31 }
 0x21d   : > { %v348_v33 = vadd.f32 1e-05, %v346_v32 }
 0x21e   : > { %v345_v34 = vpop.xlane.xlu1 %344 }
 0x21f   : > { %552 = vrsqrt.f32 %v348_v33  ;;  %v347_v35 = vmul.f32 0.015625, %v345_v34 }
 0x221   : > { %v349_v36 = vadd.f32 1e-05, %v347_v35 }
 0x223   : > { %554 = vrsqrt.f32 %v349_v36 }
 0x229   : > { %v553_v37 = vpop.eup %552 }
 0x22a   : > { %v352_v39 = vmul.f32 %v553_v37, %v336_v23 }
 0x22c   : > { %v360_v41 = vmul.f32 %v458_v38, %v352_v39 }
 0x22d   : > { %v555_v42 = vpop.eup %554 }
 0x22e   : > { %v353_v43 = vmul.f32 %v555_v42, %v337_v27  ;;  %v368_v44 = vadd.f32 %v459_v40, %v360_v41 }
 0x230   : > { %v361_v45 = vmul.f32 %v458_v38, %v353_v43  ;;  %370 = vst.msk [vmem:[%s218_s25] sm:$0xff] %vm243_vm0, %v368_v44 }
 0x232   : > { %v369_v46 = vadd.f32 %v459_v40, %v361_v45 }
 0x234   : > { %371 = vst.msk [vmem:[%s218_s25 + $0x8] sm:$0xff] %vm243_vm0, %v369_v46 }
 0x235   : > { %569 = shalt.err (!%p566_p3)
}
 0x236   : > { %s570_s12 = scalar_lea.hbm %s750_s7, 256  ;;  %s574_s15 = scalar_lea.hbm %s801_s5, 512 }
 0x237   : > { %p571_p4 = scmp.ne.s32.totalorder %s750_s7, %s570_s12  ;;  %p575_p9 = scmp.lt.u32.totalorder %s750_s7, %s801_s5 }
 0x238   : > { %p576_p10 = scmp.lt.u32.totalorder %s574_s15, %s570_s12  ;;  %p578_p12 = scmp.lt.u32.totalorder %s570_s12, %s750_s7 }
 0x239   : > { %p572_p7 = pnand %p571_p4, %p691_p5 }
 0x23a   : > { %p577_p11 = por %p576_p10, %p575_p9 }
 0x23b   : > { %p573_p8 = pneg %p572_p7 }
 0x23c   : > { %p579_p13 = por %p578_p12, %p577_p11 }
 0x23e   : > { %p580_p0 = pnand %p579_p13, %p573_p8 }
 0x240   : > { %583 = shalt.err (!%p580_p0)
}
 0x241   : > { %s621_s23 = smov 128   ;;  %s622_s25 = smov 8  }
 0x242   : > { %511 = dma.vmem_to_hbm [thread:$0]  (%p691_p5), %s752_s26, 256, %s750_s7, %s755_s8, %s621_s23, %s621_s23, %s622_s25  }
 0x243 PF: > { %p517_p1 = scmp.ge.s32.totalorder %s618_s21, 2  ;;  %s401_s30 = sand.u32 1, %s606_s18  }
 0x244   : > { %s402_s6 = scalar_lea.sflag [#allocation3], %s401_s30 }
 0x245   : > { %p514_p2 = pnand %p517_p1, %p695_p6 }
 0x247   : > { %601 = dma.done.wait (!%p514_p2), %s402_s6, 256  }
 0x248   : > { %603 = vsyncadd (!%p514_p2), %s402_s6, 4294967040  ;;  %p15_p3 = scmp.ge.s32.totalorder %s678_s24, 4   ;;  %s804_s18 = smov %s610_s19 }
 0x249   : > { %s805_s19 = smov %s614_s20  ;;  %s806_s20 = smov %s689_s27 }
 0x24a   : > { %s807_s21 = smov %s678_s24  ;;  %17 = sbr.rel (!%p15_p3) target bundleno = 3 (0x3), region = 75 }
 0x251   :  { %407 = vsyncpa [#allocation3], 1 }
 0x252   :  { %409 = vsyncpa [#allocation3 + $0x1], 1 }

// kernel: resampler_forward.5
= control target key start
LH: loop header
LB: loop body
LE: loop exit
PB: predicated region body
PF: predicated region fallthrough
CT: control target
= control target key end

     0   :  { %s4815_s25 = smov 0   ;;  %s5451_s0 = inlined_call_operand.vmem [shape: f32[4,16,64], index: 0, kind: input, shape index: {}]   ;;  %s5452_s1 = inlined_call_operand.vmem [shape: f32[4,8,64], index: 1, kind: input, shape index: {}]   ;;  %s5453_s2 = inlined_call_operand.vmem [shape: f32[1,64], index: 2, kind: input, shape index: {}]   ;;  %s5454_s3 = inlined_call_operand.vmem [shape: f32[1,64], index: 3, kind: input, shape index: {}]   ;;  %s5455_s4 = inlined_call_operand.vmem [shape: f32[1,64], index: 4, kind: input, shape index: {}]   ;;  %s5456_s5 = inlined_call_operand.vmem [shape: f32[1,64], index: 5, kind: input, shape index: {}]   ;;  %s5457_s6 = inlined_call_operand.vmem [shape: f32[64,192], index: 6, kind: input, shape index: {}]   ;;  %s5458_s7 = inlined_call_operand.vmem [shape: f32[64,128], index: 7, kind: input, shape index: {}]   ;;  %s5459_s8 = inlined_call_operand.vmem [shape: f32[64,64], index: 8, kind: input, shape index: {}]   ;;  %s5460_s9 = inlined_call_operand.vmem [shape: f32[1,64], index: 9, kind: input, shape index: {}]   ;;  %s5461_s10 = inlined_call_operand.vmem [shape: f32[1,64], index: 10, kind: input, shape index: {}]   ;;  %s5462_s11 = inlined_call_operand.vmem [shape: f32[64,128], index: 11, kind: input, shape index: {}]   ;;  %s5463_s12 = inlined_call_operand.vmem [shape: f32[128,64], index: 12, kind: input, shape index: {}]   ;;  %s5464_s13 = inlined_call_operand.vmem [shape: f32[4,8,64], index: 13, kind: output, shape index: {}]  }
   0x1 LB: > { %s3897_s26 = sadd.s32 4294967295, %s4733_s25   ;;  %p3901_p0 = scmp.ge.s32.totalorder %s4733_s25, 1  ;;  %s4733_s25 = sphi %s4815_s25, %s23_s25  }
   0x2   : > { %p400_p1 = scmp.lt.s32.totalorder %s4733_s25, 3 }
   0x4   : > { %p401_p2 = pnand %p3901_p0, %p400_p1 }
   0x5   : > { %s3902_s27 = sshll.u32 (!%p401_p2), %s3897_s26, 1  ;;  %vm477_vm0 = vcmask (!%p401_p2), 523264   ;;  %v595_v42 = vld [vmem:[%s5458_s7] sm:$0xff] (!%p401_p2)  ;;  %v596_v43 = vld [vmem:[%s5458_s7 + $0x8] sm:$0xff] (!%p401_p2)  ;;  %v597_v45 = vld [vmem:[%s5458_s7 + $0x10] sm:$0xff] (!%p401_p2)  ;;  %vm4737_vm1 = vmmov (!%p401_p2), 0  }
   0x6   : > { %404 = sbr.rel (%p401_p2) target bundleno = 3568 (0xdf0), region = 72  ;;  %p451_p3 = scmp.lt.s32.totalorder (!%p401_p2), %s3902_s27, 3  ;;  %v4401_v44 = vpack.c.bf16 (!%p401_p2), %v596_v43, %v595_v42  ;;  %v598_v46 = vld [vmem:[%s5458_s7 + $0x18] sm:$0xff] (!%p401_p2)  ;;  %v599_v48 = vld [vmem:[%s5458_s7 + $0x20] sm:$0xff] (!%p401_p2)  ;;  %v600_v49 = vld [vmem:[%s5458_s7 + $0x28] sm:$0xff] (!%p401_p2)  ;;  %vm799_vm2 = vcmask (!%p401_p2), 130048  }
   0x7   : > { %v4405_v47 = vpack.c.bf16 (!%p401_p2), %v598_v46, %v597_v45  ;;  %v4409_v50 = vpack.c.bf16 (!%p401_p2), %v600_v49, %v599_v48  ;;  %v601_v51 = vld [vmem:[%s5458_s7 + $0x30] sm:$0xff] (!%p401_p2)  ;;  %v602_v52 = vld [vmem:[%s5458_s7 + $0x38] sm:$0xff] (!%p401_p2)  ;;  %v701_v54 = vld [vmem:[%s5457_s6 + $0x8] sm:$0xff] (!%p401_p2)  ;;  %v4735_v49 = vmov (!%p401_p2), 0.0   ;;  %s4738_s23 = smov (!%p401_p2), 64   ;;  %vm1112_vm4 = vcmask (!%p401_p2), 64512  }
   0x8   : > { %4402 = vmatprep.subr.bf16.mxu1 (!%p401_p2), %v4401_v44  ;;  %v4413_v53 = vpack.c.bf16 (!%p401_p2), %v602_v52, %v601_v51  ;;  %v703_v55 = vld [vmem:[%s5457_s6 + $0x18] sm:$0xff] (!%p401_p2)  ;;  %v708_v43 = vld [vmem:[%s5457_s6 + $0x40] sm:$0xff] (!%p401_p2)  ;;  %v713_v46 = vld [vmem:[%s5457_s6 + $0x68] sm:$0xff] (!%p401_p2)  ;;  %4140 = vmatprep.mubr.msk.f32.mxu0 (!%p401_p2), %vm4737_vm1, %v4735_v49  ;;  %s4739_s24 = smov (!%p401_p2), 112   ;;  %s4740_s26 = smov (!%p401_p2), 48   ;;  %vm2133_vm5 = vcmask (!%p401_p2), 261248  }
   0x9   : > { %4404 = vmatpush3.bf16.msra.mxu1 (!%p401_p2), %v4401_v44  ;;  %v4417_v56 = vpack.c.bf16 (!%p401_p2), %v703_v55, %v701_v54  ;;  %v710_v44 = vld [vmem:[%s5457_s6 + $0x50] sm:$0xff] (!%p401_p2)  ;;  %v712_v52 = vld [vmem:[%s5457_s6 + $0x60] sm:$0xff] (!%p401_p2)  ;;  %vm4981_vm3 = vmpackc.low (!%p401_p2), %vm799_vm2, %vm799_vm2  ;;  %s4742_s30 = smov (!%p401_p2), 32   ;;  %s4743_s14 = smov (!%p401_p2), 80   ;;  %vm2810_vm6 = vcmask (!%p401_p2), 392448   ;;  %vm3487_vm7 = vcmask (!%p401_p2), 523648  }
   0xa   : > { %4406 = vmatprep.subr.bf16.mxu1 (!%p401_p2), %v4405_v47  ;;  %v4427_v48 = vpack.c.bf16 (!%p401_p2), %v710_v44, %v708_v43  ;;  %v3911_v55 = vld [vmem:[%s5455_s4] ss:$0 sm:$0xff] (!%p401_p2) }
   0xd   : > { %s5468_s27 = smov (!%p451_p3, %s3902_s27), 3  ;;  %4408 = vmatpush3.bf16.msra.mxu1 %v4405_v47  ;;  %v715_v47 = vld [vmem:[%s5457_s6 + $0x78] sm:$0xff] }
   0xe   : > { %s3983_s28 = sshll.u32 %s5468_s27, 4  ;;  %s3906_s29 = sshll.u32 %s5468_s27, 3  ;;  %4410 = vmatprep.subr.bf16.mxu1 %v4409_v50  ;;  %v4429_v51 = vpack.c.bf16 %v715_v47, %v713_v46 }
   0xf   : > { %s455_s15 = scalar_lea.vmem %s5451_s0, %s3983_s28  ;;  %s4837_s18 = scalar_lea.vmem %s5452_s1, %s3906_s29 }
  0x10   : > { %v469_v0 = vld [vmem:[%s455_s15] sm:$0xff]  ;;  %v471_v1 = vld [vmem:[%s455_s15 + $0x10] sm:$0xff]  ;;  %v470_v2 = vld [vmem:[%s455_s15 + $0x8] sm:$0xff]  ;;  %s4741_s28 = smov 96   ;;  %s467_s19 = scalar_lea.vmem %s5464_s13, %s3906_s29 }
  0x11   : > { %v478_v3 = vsel %vm477_vm0, %v469_v0, 0.0  ;;  %v484_v4 = vsel %vm477_vm0, %v471_v1, 0.0  ;;  %v472_v5 = vld [vmem:[%s455_s15 + $0x18] sm:$0xff]  ;;  %v481_v6 = vsel %vm477_vm0, %v470_v2, 0.0  ;;  %v473_v8 = vld [vmem:[%s4837_s18] sm:$0xff]  ;;  %v474_v9 = vld [vmem:[%s4837_s18 + $0x8] sm:$0xff]  ;;  %4412 = vmatpush3.bf16.msra.mxu1 %v4409_v50 }
  0x12   : > { %479 = vadd.xlane.f32.xlu0 %v478_v3  ;;  %485 = vadd.xlane.f32.xlu1 %v484_v4  ;;  %v487_v7 = vsel %vm477_vm0, %v472_v5, 0.0  ;;  %v553_v10 = vsel %vm477_vm0, %v473_v8, 0.0  ;;  %v556_v11 = vsel %vm477_vm0, %v474_v9, 0.0  ;;  %s4744_s15 = smov 16  }
  0x13   : > { %4414 = vmatprep.subr.bf16.mxu1 %v4413_v53 }
  0x15   : > { %4416 = vmatpush3.bf16.msra.mxu1 %v4413_v53  ;;  %v714_v53 = vld [vmem:[%s5457_s6 + $0x70] sm:$0xff] }
  0x16   : > { %482 = vadd.xlane.f32.xlu0 %v481_v6  ;;  %488 = vadd.xlane.f32.xlu1 %v487_v7 }
  0x17   : > { %4418 = vmatprep.subr.bf16.mxu1 %v4417_v56  ;;  %v4431_v56 = vpack.c.bf16 %v714_v53, %v712_v52 }
  0x1a   : > { %554 = vadd.xlane.f32.xlu0 %v553_v10  ;;  %557 = vadd.xlane.f32.xlu1 %v556_v11  ;;  %v3909_v11 = vld [vmem:[%s5453_s2] ss:$0 sm:$0xff] }
  0x9f   : > { %v480_v12 = vpop.xlane.xlu0 %479  ;;  %v486_v13 = vpop.xlane.xlu1 %485 }
  0xa0   : > { %v491_v14 = vmul.f32 0.015625, %v480_v12  ;;  %v493_v15 = vmul.f32 0.015625, %v486_v13  ;;  %v3910_v13 = vld [vmem:[%s5454_s3] ss:$0 sm:$0xff] }
  0xa2   : > { %v4845_v16 = vsub.f32 %v469_v0, %v491_v14  ;;  %v4847_v17 = vsub.f32 %v471_v1, %v493_v15 }
  0xa3   : > { %v483_v18 = vpop.xlane.xlu0 %482  ;;  %v489_v19 = vpop.xlane.xlu1 %488 }
  0xa4   : > { %v492_v20 = vmul.f32 0.015625, %v483_v18  ;;  %v494_v21 = vmul.f32 0.015625, %v489_v19  ;;  %v499_v22 = vmul.f32 %v4845_v16, %v4845_v16  ;;  %v501_v23 = vmul.f32 %v4847_v17, %v4847_v17 }
  0xa6   : > { %v4853_v24 = vsub.f32 %v470_v2, %v492_v20  ;;  %v4855_v25 = vsub.f32 %v472_v5, %v494_v21  ;;  %v503_v26 = vsel %vm477_vm0, %v499_v22, 0.0  ;;  %v509_v29 = vsel %vm477_vm0, %v501_v23, 0.0  ;;  %v700_v22 = vld [vmem:[%s5457_s6] sm:$0xff] }
  0xa7   : > { %504 = vadd.xlane.f32.xlu0 %v503_v26  ;;  %v555_v27 = vpop.xlane.xlu0 %554  ;;  %v558_v28 = vpop.xlane.xlu1 %557  ;;  %v705_v26 = vld [vmem:[%s5457_s6 + $0x28] sm:$0xff] }
  0xa8   : > { %v559_v30 = vmul.f32 0.015625, %v555_v27  ;;  %v560_v31 = vmul.f32 0.015625, %v558_v28  ;;  %v500_v32 = vmul.f32 %v4853_v24, %v4853_v24  ;;  %v502_v33 = vmul.f32 %v4855_v25, %v4855_v25  ;;  %v707_v27 = vld [vmem:[%s5457_s6 + $0x38] sm:$0xff] }
  0xaa   : > { %v4863_v34 = vsub.f32 %v473_v8, %v559_v30  ;;  %v4865_v35 = vsub.f32 %v474_v9, %v560_v31  ;;  %v506_v36 = vsel %vm477_vm0, %v500_v32, 0.0  ;;  %v512_v37 = vsel %vm477_vm0, %v502_v33, 0.0 }
  0xab   : > { %510 = vadd.xlane.f32.xlu0 %v509_v29  ;;  %507 = vadd.xlane.f32.xlu1 %v506_v36  ;;  %v4421_v32 = vpack.c.bf16 %v707_v27, %v705_v26  ;;  %v706_v36 = vld [vmem:[%s5457_s6 + $0x30] sm:$0xff] }
  0xac   : > { %v563_v38 = vmul.f32 %v4863_v34, %v4863_v34  ;;  %v564_v39 = vmul.f32 %v4865_v35, %v4865_v35 }
  0xae   : > { %v565_v40 = vsel %vm477_vm0, %v563_v38, 0.0  ;;  %v568_v41 = vsel %vm477_vm0, %v564_v39, 0.0  ;;  %v709_v38 = vld [vmem:[%s5457_s6 + $0x48] sm:$0xff]  ;;  %v711_v39 = vld [vmem:[%s5457_s6 + $0x58] sm:$0xff] }
  0xaf   : > { %513 = vadd.xlane.f32.xlu1 %v512_v37  ;;  %566 = vadd.xlane.f32.xlu0 %v565_v40  ;;  %v4425_v42 = vpack.c.bf16 %v711_v39, %v709_v38 }
  0xb3   : > { %569 = vadd.xlane.f32.xlu1 %v568_v41 }
 0x134   : > { %v505_v57 = vpop.xlane.xlu0 %504 }
 0x135   : > { %v515_v58 = vmul.f32 0.015625, %v505_v57 }
 0x137   : > { %v519_v59 = vadd.f32 1e-05, %v515_v58  ;;  %v3912_v58 = vld [vmem:[%s5456_s5] ss:$0 sm:$0xff] }
 0x138   : > { %v508_v60 = vpop.xlane.xlu1 %507  ;;  %v511_v61 = vpop.xlane.xlu0 %510 }
 0x139   : > { %4657 = vrsqrt.f32 %v519_v59  ;;  %v516_v62 = vmul.f32 0.015625, %v508_v60  ;;  %v517_v63 = vmul.f32 0.015625, %v511_v61 }
 0x13b   : > { %v520_v0 = vadd.f32 1e-05, %v516_v62  ;;  %v521_v1 = vadd.f32 1e-05, %v517_v63  ;;  %v4736_v62 = vmov 0.0|0.0  }
 0x13c   : > { %v514_v2 = vpop.xlane.xlu1 %513  ;;  %v567_v3 = vpop.xlane.xlu0 %566  ;;  %4433 = vmatprep.subr.bf16.mxu0 %v4736_v62 }
 0x13d   : > { %4659 = vrsqrt.f32 %v520_v0  ;;  %v518_v4 = vmul.f32 0.015625, %v514_v2  ;;  %v571_v6 = vmul.f32 0.015625, %v567_v3 }
 0x13e   : > { %4661 = vrsqrt.f32 %v521_v1 }
 0x13f   : > { %v522_v5 = vadd.f32 1e-05, %v518_v4  ;;  %v573_v9 = vadd.f32 1e-05, %v571_v6 }
 0x140   : > { %v570_v7 = vpop.xlane.xlu1 %569 }
 0x141   : > { %4663 = vrsqrt.f32 %v522_v5  ;;  %v572_v10 = vmul.f32 0.015625, %v570_v7 }
 0x142   : > { %4665 = vrsqrt.f32 %v573_v9 }
 0x143   : > { %v4658_v8 = vpop.eup %4657  ;;  %v574_v18 = vadd.f32 1e-05, %v572_v10 }
 0x144   : > { %v527_v12 = vmul.f32 %v4658_v8, %v4845_v16  ;;  %v702_v16 = vld [vmem:[%s5457_s6 + $0x10] sm:$0xff] }
 0x145   : > { %4667 = vrsqrt.f32 %v574_v18  ;;  %v4419_v29 = vpack.c.bf16 %v702_v16, %v700_v22 }
 0x146   : > { %v537_v14 = vmul.f32 %v3909_v11, %v527_v12 }
 0x147   : > { %v4660_v15 = vpop.eup %4659 }
 0x148   : > { %v4662_v19 = vpop.eup %4661  ;;  %v547_v20 = vadd.f32 %v3910_v13, %v537_v14  ;;  %v528_v21 = vmul.f32 %v4660_v15, %v4853_v24 }
 0x149   : > { %v529_v23 = vmul.f32 %v4662_v19, %v4847_v17  ;;  %v704_v17 = vld [vmem:[%s5457_s6 + $0x20] sm:$0xff] }
 0x14a   : > { %4130 = vmatprep.mubr.msk.f32.mxu1 %vm477_vm0, %v547_v20  ;;  %v538_v24 = vmul.f32 %v3909_v11, %v528_v21  ;;  %v4423_v40 = vpack.c.bf16 %v706_v36, %v704_v17 }
 0x14b   : > { %v4664_v28 = vpop.eup %4663  ;;  %v539_v30 = vmul.f32 %v3909_v11, %v529_v23 }
 0x14c   : > { %v548_v31 = vadd.f32 %v3910_v13, %v538_v24  ;;  %v530_v33 = vmul.f32 %v4664_v28, %v4855_v25  ;;  %v4666_v45 = vpop.eup %4665 }
 0x14d   : > { %v549_v37 = vadd.f32 %v3910_v13, %v539_v30  ;;  %v577_v50 = vmul.f32 %v4666_v45, %v4863_v34 }
 0x14e   : > { %4131 = vmatmul.mubr.msk.f32.vlgmr.msra.gmra.mrb[0].mxu1 %vm477_vm0, %v548_v31  ;;  %v540_v25 = vmul.f32 %v3909_v11, %v530_v33 }
 0x14f   : > { %4420 = vmatpush1.bf16.msra.mxu1 %v4419_v29  ;;  %4133 = vmatprep.mubr.msk.f32.mxu1 %vm477_vm0, %v549_v37  ;;  %v4668_v54 = vpop.eup %4667  ;;  %v585_v57 = vmul.f32 %v3911_v55, %v577_v50 }
 0x150   : > { %4422 = vmatprep.subr.bf16.mxu1 %v4421_v32  ;;  %v550_v41 = vadd.f32 %v3910_v13, %v540_v25  ;;  %v578_v34 = vmul.f32 %v4668_v54, %v4865_v35 }
 0x151   : > { %v593_v59 = vadd.f32 %v3912_v58, %v585_v57 }
 0x152   : > { %4134 = vmatmul.mubr.msk.f32.gmra.mrb[2].mxu1 %vm477_vm0, %v550_v41  ;;  %v586_v60 = vmul.f32 %v3911_v55, %v578_v34 }
 0x153   : > { %4424 = vmatpush1.bf16.msra.mxu1 %v4423_v40  ;;  %786 = vmatprep.mubr.f32.mxu1 %v4735_v49 }
 0x154   : > { %4426 = vmatprep.subr.bf16.mxu1 %v4425_v42  ;;  %v594_v61 = vadd.f32 %v3912_v58, %v586_v60 }
 0x157   : > { %4428 = vmatpush1.bf16.msra.mxu1 %v4427_v48 }
 0x158   : > { %4430 = vmatprep.subr.bf16.mxu1 %v4429_v51 }
 0x15b   : > { %4432 = vmatpush1.bf16.msra.mxu1 %v4431_v56 }
 0x15c   : > { %4437 = vmatprep.subr.bf16.mxu1 %v4736_v62 }
 0x15e   : > { %3917 = vmatmul.mubr.msk.f32.vlgmr.msra.gmra.mrb[4].mxu1 %vm477_vm0, %v593_v59 }
 0x15f   : > { %792 = vmatprep.mubr.f32.mxu1 %v4735_v49 }
 0x162   : > { %3918 = vmatmul.mubr.msk.f32.gmra.mrb[6].mxu1 %vm477_vm0, %v594_v61 }
 0x163   : > { %4147 = vmatprep.mubr.msk.f32.mxu1 %vm4737_vm1, %v4735_v49 }
 0x221   : > { %v4132_v35 = vpop.f32.mrb[0].mxu1 }
 0x222   : > { %v681_v63 = vpop.f32.mrb[1].mxu1 }
 0x223   : > { %v4434_v1 = vpack.c.bf16 %v4132_v35, %v681_v63  ;;  %v4985_v2 = vpack.i.bf16 %v4132_v35, %v681_v63 }
 0x225   : > { %v4135_v3 = vpop.f32.mrb[2].mxu1  ;;  %4436 = vmatpush3.bf16.xpose.msk.msra.mxu0 %vm4981_vm3, %v4434_v1 }
 0x226   : > { %v691_v4 = vpop.f32.mrb[3].mxu1  ;;  %4150 = vmatprep.subr.mxu0 %v4735_v49 }
 0x227   : > { %v4438_v5 = vpack.c.bf16 %v4135_v3, %v691_v4  ;;  %v4990_v6 = vpack.i.bf16 %v4135_v3, %v691_v4 }
 0x229   : > { %4440 = vmatpush3.bf16.xpose.msk.msra.mxu1 %vm4981_vm3, %v4438_v5 }
 0x22a   : > { %4155 = vmatprep.subr.mxu1 %v4735_v49 }
 0x231   : > { %v4995_v7 = vpop.f32.mrb[4].mxu1 }
 0x232   : > { %958 = vrot.lane.b32.xlu0 %v4995_v7, %s4738_s23  ;;  %v4999_v8 = vpop.f32.mrb[5].mxu1  ;;  %4141 = vmatmul.mubr.msk.f32.vlgmr.msra.gmra.mrb[0].mxu0 %vm799_vm2, %v4995_v7 }
 0x233   : > { %4152 = vmatprep.mubr.msk.f32.mxu0 %vm4737_vm1, %v4735_v49 }
 0x235   : > { %v5005_v9 = vpop.f32.mrb[6].mxu1 }
 0x236   : > { %1032 = vrot.lane.b32.xlu1 %v5005_v9, %s4738_s23  ;;  %v5009_v10 = vpop.f32.mrb[7].mxu1  ;;  %4148 = vmatmul.mubr.msk.f32.vlgmr.msra.gmra.mrb[8].mxu1 %vm799_vm2, %v5005_v9 }
 0x237   : > { %4157 = vmatprep.mubr.msk.f32.mxu1 %vm4737_vm1, %v4735_v49 }
 0x2a4   : > { %v959_v11 = vpop.permute.xlu0 %958 }
 0x2a5   : > { %4151 = vmatpush3.xpose.msk.msra.mxu0 %vm799_vm2, %v959_v11 }
 0x2a6   : > { %4160 = vmatprep.subr.mxu0 %v4735_v49 }
 0x2a8   : > { %4153 = vmatmul.mubr.msk.f32.vlgmr.msra.gmra.mrb[2].mxu0 %vm799_vm2, %v4995_v7  ;;  %v1033_v12 = vpop.permute.xlu1 %1032 }
 0x2a9   : > { %4156 = vmatpush3.xpose.msk.msra.mxu1 %vm799_vm2, %v1033_v12  ;;  %4161 = vmatpush3.msra.mxu0 %v4999_v8 }
 0x2aa   : > { %4165 = vmatprep.subr.mxu1 %v4735_v49  ;;  %4162 = vmatprep.mubr.msk.f32.mxu0 %vm4737_vm1, %v4735_v49 }
 0x2ab   : > { %4441 = vmatprep.subr.bf16.mxu0 %v4736_v62 }
 0x2ac   : > { %4158 = vmatmul.mubr.msk.f32.vlgmr.msra.gmra.mrb[10].mxu1 %vm799_vm2, %v5005_v9 }
 0x2ad   : > { %4166 = vmatpush3.msra.mxu1 %v5009_v10  ;;  %4167 = vmatprep.mubr.msk.f32.mxu1 %vm4737_vm1, %v4735_v49 }
 0x2ae   : > { %4444 = vmatprep.subr.bf16.mxu1 %v4736_v62 }
 0x305   : > { %v875_v13 = vpop.f32.mrb[0].mxu0 }
 0x306   : > { %v4142_v14 = vpop.f32.mrb[1].mxu0  ;;  %v1106_v15 = vsel %vm799_vm2, %v875_v13, -inf }
 0x307   : > { %1107 = vmax.xlane.f32.xlu1 %v1106_v15 }
 0x309   : > { %v954_v18 = vpop.f32.mrb[8].mxu1 }
 0x30a   : > { %v4149_v19 = vpop.f32.mrb[9].mxu1  ;;  %v1109_v20 = vsel %vm799_vm2, %v954_v18, -inf }
 0x30b   : > { %1110 = vmax.xlane.f32.xlu0 %v1109_v20 }
 0x318   : > { %4593 = vrot.lane.b32.xlu1 %v4990_v6, %s4738_s23 }
 0x37b   : > { %v1028_v21 = vpop.f32.mrb[2].mxu0 }
 0x37c   : > { %v4154_v22 = vpop.f32.mrb[3].mxu0  ;;  %v1113_v16 = vsel %vm1112_vm4, %v1028_v21, -inf }
 0x37d   : > { %1114 = vmax.xlane.f32.xlu0 %v1113_v16 }
 0x37f   : > { %v1102_v23 = vpop.f32.mrb[10].mxu1 }
 0x380   : > { %v4159_v26 = vpop.f32.mrb[11].mxu1  ;;  %v1116_v27 = vsel %vm1112_vm4, %v1102_v23, -inf }
 0x381   : > { %1117 = vmax.xlane.f32.xlu1 %v1116_v27 }
 0x392   : > { %4598 = vrot.lane.b32.xlu1 %v4985_v2, %s4739_s24 }
 0x393   : > { %4588 = vrot.lane.b32.xlu0 %v4985_v2, %s4738_s23 }
 0x394   : > { %v1108_v24 = vpop.xlane.xlu1 %1107 }
 0x396   : > { %4603 = vrot.lane.b32.xlu1 %v4990_v6, %s4739_s24 }
 0x397   : > { %1457 = vrot.lane.b32.xlu0 %v4995_v7, %s4739_s24 }
 0x398   : > { %v1111_v28 = vpop.xlane.xlu0 %1110  ;;  %v4594_v29 = vpop.permute.xlu1 %4593 }
 0x399   : > { %v4596_v47 = vunpack.i.h.bf16 %v4594_v29  ;;  %v4595_v48 = vunpack.i.l.bf16 %v4594_v29 }
 0x39a   : > { %1539 = vrot.lane.b32.xlu1 %v5005_v9, %s4739_s24 }
 0x39b   : > { %1621 = vrot.lane.b32.xlu0 %v4995_v7, %s4740_s26  ;;  %v4445_v52 = vpack.c.bf16 %v4596_v47, %v4595_v48 }
 0x39e   : > { %1695 = vrot.lane.b32.xlu1 %v5005_v9, %s4740_s26 }
 0x40a   : > { %v1115_v30 = vpop.xlane.xlu0 %1114 }
 0x40b   : > { %v1119_v31 = vmax.f32 %v1108_v24, %v1115_v30 }
 0x40d   : > { %v1127_v32 = vsub.f32 %v1028_v21, %v1119_v31  ;;  %v1121_v37 = vsub.f32 %v875_v13, %v1119_v31 }
 0x40e   : > { %v1118_v33 = vpop.xlane.xlu1 %1117  ;;  %v4589_v25 = vpop.permute.xlu0 %4588 }
 0x40f   : > { %v1129_v17 = vmul.f32 1.442695, %v1127_v32  ;;  %v1120_v36 = vmax.f32 %v1111_v28, %v1118_v33  ;;  %v1123_v40 = vmul.f32 1.442695, %v1121_v37  ;;  %v4591_v42 = vunpack.i.h.bf16 %v4589_v25 }
 0x410   : > { %v4590_v43 = vunpack.i.l.bf16 %v4589_v25 }
 0x411   : > { %4669 = vpow2.f32 %v1129_v17  ;;  %v1128_v38 = vsub.f32 %v1102_v23, %v1120_v36  ;;  %v1122_v41 = vsub.f32 %v954_v18, %v1120_v36 }
 0x412   : > { %v4442_v46 = vpack.c.bf16 %v4591_v42, %v4590_v43  ;;  %v4599_v50 = vpop.permute.xlu1 %4598  ;;  %v1458_v59 = vpop.permute.xlu0 %1457 }
 0x413   : > { %v1131_v39 = vmul.f32 1.442695, %v1128_v38  ;;  %v1125_v44 = vmul.f32 1.442695, %v1122_v41  ;;  %v4601_v53 = vunpack.i.h.bf16 %v4599_v50  ;;  %v4600_v54 = vunpack.i.l.bf16 %v4599_v50 }
 0x415   : > { %4671 = vpow2.f32 %v1131_v39  ;;  %v4448_v57 = vpack.c.bf16 %v4601_v53, %v4600_v54 }
 0x416   : > { %4673 = vpow2.f32 %v1123_v40  ;;  %v4604_v55 = vpop.permute.xlu1 %4603  ;;  %v1622_v63 = vpop.permute.xlu0 %1621 }
 0x417   : > { %4675 = vpow2.f32 %v1125_v44  ;;  %v4606_v34 = vunpack.i.h.bf16 %v4604_v55  ;;  %v4605_v58 = vunpack.i.l.bf16 %v4604_v55 }
 0x419   : > { %v4452_v61 = vpack.c.bf16 %v4606_v34, %v4605_v58 }
 0x41a   : > { %v1540_v35 = vpop.permute.xlu1 %1539 }
 0x41b   : > { %v5051_v45 = vpop.eup %4669 }
 0x41c   : > { %4163 = vmatmul.mubr.msk.f32.vlgmr.msra.gmra.mrb[4].mxu0 %vm1112_vm4, %v5051_v45 }
 0x41d   : > { %4443 = vmatpush3.bf16.msra.mxu0 %v4442_v46  ;;  %4174 = vmatprep.mubr.msk.f32.mxu0 %vm4737_vm1, %v4735_v49 }
 0x41e   : > { %4447 = vmatprep.subr.bf16.mxu0 %v4736_v62  ;;  %v1696_v1 = vpop.permute.xlu1 %1695 }
 0x41f   : > { %v5058_v51 = vpop.eup %4671 }
 0x420   : > { %4168 = vmatmul.mubr.msk.f32.vlgmr.msra.gmra.mrb[12].mxu1 %vm1112_vm4, %v5058_v51  ;;  %v5064_v56 = vpop.eup %4673 }
 0x421   : > { %4446 = vmatpush3.bf16.msra.mxu1 %v4445_v52  ;;  %4181 = vmatprep.mubr.msk.f32.mxu1 %vm4737_vm1, %v4735_v49  ;;  %v5074_v60 = vpop.eup %4675 }
 0x422   : > { %4451 = vmatprep.subr.bf16.mxu1 %v4736_v62 }
 0x424   : > { %4175 = vmatmul.mubr.msk.f32.vlgmr.msra.gmra.mrb[4].mxu0 %vm799_vm2, %v5064_v56 }
 0x425   : > { %4188 = vmatprep.mubr.msk.f32.mxu0 %vm4737_vm1, %v4735_v49 }
 0x426   : > { %4450 = vmatpush3.bf16.xpose.msk.msra.mxu0 %vm4981_vm3, %v4448_v57 }
 0x427   : > { %4198 = vmatprep.subr.mxu0 %v4735_v49 }
 0x428   : > { %4182 = vmatmul.mubr.msk.f32.vlgmr.msra.gmra.mrb[12].mxu1 %vm799_vm2, %v5074_v60 }
 0x429   : > { %4195 = vmatprep.mubr.msk.f32.mxu1 %vm4737_vm1, %v4735_v49 }
 0x42a   : > { %4454 = vmatpush3.bf16.xpose.msk.msra.mxu1 %vm4981_vm3, %v4452_v61 }
 0x42b   : > { %4203 = vmatprep.subr.mxu1 %v4735_v49 }
 0x42d   : > { %4189 = vmatmul.mubr.msk.f32.vlgmr.msra.gmra.mrb[6].mxu0 %vm799_vm2, %v1458_v59 }
 0x42e   : > { %4199 = vmatpush3.xpose.msk.msra.mxu0 %vm799_vm2, %v1622_v63  ;;  %4200 = vmatprep.mubr.msk.f32.mxu0 %vm4737_vm1, %v4735_v49 }
 0x42f   : > { %4208 = vmatprep.subr.mxu0 %v4735_v49 }
 0x431   : > { %4201 = vmatmul.mubr.msk.f32.vlgmr.msra.gmra.mrb[8].mxu0 %vm799_vm2, %v1458_v59  ;;  %4196 = vmatmul.mubr.msk.f32.vlgmr.msra.gmra.mrb[14].mxu1 %vm799_vm2, %v1540_v35 }
 0x432   : > { %4210 = vmatprep.mubr.msk.f32.mxu0 %vm4737_vm1, %v4735_v49  ;;  %4204 = vmatpush3.xpose.msk.msra.mxu1 %vm799_vm2, %v1696_v1 }
 0x433   : > { %4205 = vmatprep.mubr.msk.f32.mxu1 %vm4737_vm1, %v4735_v49  ;;  %4213 = vmatprep.subr.mxu1 %v4735_v49 }
 0x435   : > { %4206 = vmatmul.mubr.msk.f32.vlgmr.msra.gmra.mrb[16].mxu1 %vm799_vm2, %v1540_v35 }
 0x436   : > { %4215 = vmatprep.mubr.msk.f32.mxu1 %vm4737_vm1, %v4735_v49 }
 0x4f7   : > { %v5099_v3 = vpop.f32.mrb[4].mxu0 }
 0x4f8   : > { %v4176_v4 = vpop.f32.mrb[5].mxu0 }
 0x4fb   : > { %v5101_v5 = vpop.f32.mrb[12].mxu1 }
 0x4fc   : > { %v4183_v11 = vpop.f32.mrb[13].mxu1 }
 0x500   : > { %v1535_v12 = vpop.f32.mrb[6].mxu0 }
 0x501   : > { %v4190_v13 = vpop.f32.mrb[7].mxu0  ;;  %v1769_v14 = vsel %vm799_vm2, %v1535_v12, -inf }
 0x502   : > { %1770 = vmax.xlane.f32.xlu0 %v1769_v14 }
 0x504   : > { %v1691_v15 = vpop.f32.mrb[8].mxu0  ;;  %v1617_v18 = vpop.f32.mrb[14].mxu1 }
 0x505   : > { %v4202_v19 = vpop.f32.mrb[9].mxu0  ;;  %v1775_v20 = vsel %vm1112_vm4, %v1691_v15, -inf  ;;  %v4197_v21 = vpop.f32.mrb[15].mxu1  ;;  %v1772_v22 = vsel %vm799_vm2, %v1617_v18, -inf }
 0x506   : > { %1776 = vmax.xlane.f32.xlu1 %v1775_v20  ;;  %1773 = vmax.xlane.f32.xlu0 %v1772_v22 }
 0x508   : > { %v1765_v16 = vpop.f32.mrb[16].mxu1 }
 0x509   : > { %v4207_v23 = vpop.f32.mrb[17].mxu1  ;;  %v1778_v26 = vsel %vm1112_vm4, %v1765_v16, -inf }
 0x50a   : > { %1779 = vmax.xlane.f32.xlu0 %v1778_v26 }
 0x517   : > { %4608 = vrot.lane.b32.xlu1 %v4985_v2, %s4740_s26 }
 0x51b   : > { %1889 = vrot.lane.b32.xlu1 %v5009_v10, %s4739_s24 }
 0x51f   : > { %4613 = vrot.lane.b32.xlu1 %v4990_v6, %s4740_s26 }
 0x520   : > { %1812 = vrot.lane.b32.xlu0 %v4999_v8, %s4739_s24 }
 0x523   : > { %4623 = vrot.lane.b32.xlu1 %v4990_v6, %s4741_s28 }
 0x524   : > { %4618 = vrot.lane.b32.xlu0 %v4985_v2, %s4741_s28 }
 0x527   : > { %2218 = vrot.lane.b32.xlu1 %v5005_v9, %s4741_s28 }
 0x528   : > { %2136 = vrot.lane.b32.xlu0 %v4995_v7, %s4741_s28 }
 0x52b   : > { %2374 = vrot.lane.b32.xlu1 %v5005_v9, %s4742_s30 }
 0x52c   : > { %2300 = vrot.lane.b32.xlu0 %v4995_v7, %s4742_s30 }
 0x58f   : > { %v1771_v27 = vpop.xlane.xlu0 %1770 }
 0x593   : > { %v1777_v24 = vpop.xlane.xlu1 %1776  ;;  %v1774_v29 = vpop.xlane.xlu0 %1773 }
 0x594   : > { %v1781_v28 = vmax.f32 %v1771_v27, %v1777_v24 }
 0x596   : > { %v1789_v30 = vsub.f32 %v1691_v15, %v1781_v28  ;;  %v1783_v36 = vsub.f32 %v1535_v12, %v1781_v28 }
 0x597   : > { %v4609_v31 = vpop.permute.xlu1 %4608  ;;  %v1780_v33 = vpop.xlane.xlu0 %1779 }
 0x598   : > { %v1791_v32 = vmul.f32 1.442695, %v1789_v30  ;;  %v1782_v17 = vmax.f32 %v1774_v29, %v1780_v33  ;;  %v1785_v40 = vmul.f32 1.442695, %v1783_v36  ;;  %v4611_v42 = vunpack.i.h.bf16 %v4609_v31 }
 0x599   : > { %v4610_v43 = vunpack.i.l.bf16 %v4609_v31 }
 0x59a   : > { %4677 = vpow2.f32 %v1791_v32  ;;  %v1790_v37 = vsub.f32 %v1765_v16, %v1782_v17  ;;  %v1784_v41 = vsub.f32 %v1617_v18, %v1782_v17 }
 0x59b   : > { %v1890_v38 = vpop.permute.xlu1 %1889  ;;  %v1813_v39 = vpop.permute.xlu0 %1812  ;;  %v4456_v48 = vpack.c.bf16 %v4611_v42, %v4610_v43 }
 0x59c   : > { %4214 = vmatpush3.msra.mxu1 %v1890_v38  ;;  %v1793_v25 = vmul.f32 1.442695, %v1790_v37  ;;  %4209 = vmatpush3.msra.mxu0 %v1813_v39  ;;  %v1787_v46 = vmul.f32 1.442695, %v1784_v41 }
 0x59d   : > { %4458 = vmatprep.subr.bf16.mxu1 %v4736_v62  ;;  %4455 = vmatprep.subr.bf16.mxu0 %v4736_v62 }
 0x59e   : > { %4679 = vpow2.f32 %v1793_v25 }
 0x59f   : > { %4681 = vpow2.f32 %v1785_v40  ;;  %v4614_v44 = vpop.permute.xlu1 %4613  ;;  %v4619_v53 = vpop.permute.xlu0 %4618 }
 0x5a0   : > { %v4616_v50 = vunpack.i.h.bf16 %v4614_v44  ;;  %v4615_v52 = vunpack.i.l.bf16 %v4614_v44  ;;  %4683 = vpow2.f32 %v1787_v46  ;;  %v4621_v57 = vunpack.i.h.bf16 %v4619_v53 }
 0x5a1   : > { %v4620_v34 = vunpack.i.l.bf16 %v4619_v53 }
 0x5a2   : > { %v4459_v55 = vpack.c.bf16 %v4616_v50, %v4615_v52 }
 0x5a3   : > { %v4624_v58 = vpop.permute.xlu1 %4623  ;;  %v4462_v61 = vpack.c.bf16 %v4621_v57, %v4620_v34  ;;  %v2137_v1 = vpop.permute.xlu0 %2136 }
 0x5a4   : > { %v5129_v47 = vpop.eup %4677  ;;  %v4626_v35 = vunpack.i.h.bf16 %v4624_v58  ;;  %v4625_v63 = vunpack.i.l.bf16 %v4624_v58 }
 0x5a5   : > { %4211 = vmatmul.mubr.msk.f32.vlgmr.msra.gmra.mrb[10].mxu0 %vm1112_vm4, %v5129_v47 }
 0x5a6   : > { %4457 = vmatpush3.bf16.msra.mxu0 %v4456_v48  ;;  %4222 = vmatprep.mubr.msk.f32.mxu0 %vm4737_vm1, %v4735_v49  ;;  %v4466_v11 = vpack.c.bf16 %v4626_v35, %v4625_v63 }
 0x5a7   : > { %4461 = vmatprep.subr.bf16.mxu0 %v4736_v62  ;;  %v2219_v12 = vpop.permute.xlu1 %2218  ;;  %v2301_v13 = vpop.permute.xlu0 %2300 }
 0x5a8   : > { %v5136_v54 = vpop.eup %4679 }
 0x5a9   : > { %4216 = vmatmul.mubr.msk.f32.vlgmr.msra.gmra.mrb[18].mxu1 %vm1112_vm4, %v5136_v54  ;;  %v5142_v59 = vpop.eup %4681 }
 0x5aa   : > { %4460 = vmatpush3.bf16.msra.mxu1 %v4459_v55  ;;  %4229 = vmatprep.mubr.msk.f32.mxu1 %vm4737_vm1, %v4735_v49  ;;  %v5152_v4 = vpop.eup %4683 }
 0x5ab   : > { %4465 = vmatprep.subr.bf16.mxu1 %v4736_v62  ;;  %v2375_v14 = vpop.permute.xlu1 %2374 }
 0x5ad   : > { %4223 = vmatmul.mubr.msk.f32.vlgmr.msra.gmra.mrb[10].mxu0 %vm799_vm2, %v5142_v59 }
 0x5ae   : > { %4236 = vmatprep.mubr.msk.f32.mxu0 %vm4737_vm1, %v4735_v49 }
 0x5af   : > { %4464 = vmatpush3.bf16.xpose.msk.msra.mxu0 %vm4981_vm3, %v4462_v61 }
 0x5b0   : > { %4246 = vmatprep.subr.mxu0 %v4735_v49 }
 0x5b1   : > { %4230 = vmatmul.mubr.msk.f32.vlgmr.msra.gmra.mrb[18].mxu1 %vm799_vm2, %v5152_v4 }
 0x5b2   : > { %4243 = vmatprep.mubr.msk.f32.mxu1 %vm4737_vm1, %v4735_v49 }
 0x5b3   : > { %4468 = vmatpush3.bf16.xpose.msk.msra.mxu1 %vm4981_vm3, %v4466_v11 }
 0x5b4   : > { %4251 = vmatprep.subr.mxu1 %v4735_v49 }
 0x5b6   : > { %4237 = vmatmul.mubr.msk.f32.vlgmr.msra.gmra.mrb[12].mxu0 %vm799_vm2, %v2137_v1 }
 0x5b7   : > { %4247 = vmatpush3.xpose.msk.msra.mxu0 %vm799_vm2, %v2301_v13  ;;  %4248 = vmatprep.mubr.msk.f32.mxu0 %vm4737_vm1, %v4735_v49 }
 0x5b8   : > { %4256 = vmatprep.subr.mxu0 %v4735_v49 }
 0x5ba   : > { %4249 = vmatmul.mubr.msk.f32.vlgmr.msra.gmra.mrb[14].mxu0 %vm799_vm2, %v2137_v1  ;;  %4244 = vmatmul.mubr.msk.f32.vlgmr.msra.gmra.mrb[20].mxu1 %vm799_vm2, %v2219_v12 }
 0x5bb   : > { %4258 = vmatprep.mubr.msk.f32.mxu0 %vm4737_vm1, %v4735_v49  ;;  %4252 = vmatpush3.xpose.msk.msra.mxu1 %vm799_vm2, %v2375_v14 }
 0x5bc   : > { %4253 = vmatprep.mubr.msk.f32.mxu1 %vm4737_vm1, %v4735_v49  ;;  %4261 = vmatprep.subr.mxu1 %v4735_v49 }
 0x5be   : > { %4254 = vmatmul.mubr.msk.f32.vlgmr.msra.gmra.mrb[22].mxu1 %vm799_vm2, %v2219_v12 }
 0x5bf   : > { %4263 = vmatprep.mubr.msk.f32.mxu1 %vm4737_vm1, %v4735_v49 }
 0x680   : > { %v5177_v15 = vpop.f32.mrb[10].mxu0 }
 0x681   : > { %v4224_v18 = vpop.f32.mrb[11].mxu0 }
 0x684   : > { %v5179_v19 = vpop.f32.mrb[18].mxu1 }
 0x685   : > { %v4231_v20 = vpop.f32.mrb[19].mxu1 }
 0x689   : > { %v2214_v21 = vpop.f32.mrb[12].mxu0 }
 0x68a   : > { %v4238_v22 = vpop.f32.mrb[13].mxu0  ;;  %v2448_v16 = vsel %vm799_vm2, %v2214_v21, -inf }
 0x68b   : > { %2449 = vmax.xlane.f32.xlu0 %v2448_v16 }
 0x68d   : > { %v2370_v23 = vpop.f32.mrb[14].mxu0  ;;  %v2296_v26 = vpop.f32.mrb[20].mxu1 }
 0x68e   : > { %v4250_v27 = vpop.f32.mrb[15].mxu0  ;;  %v2454_v24 = vsel %vm1112_vm4, %v2370_v23, -inf  ;;  %v4245_v28 = vpop.f32.mrb[21].mxu1  ;;  %v2451_v29 = vsel %vm799_vm2, %v2296_v26, -inf }
 0x68f   : > { %2455 = vmax.xlane.f32.xlu1 %v2454_v24  ;;  %2452 = vmax.xlane.f32.xlu0 %v2451_v29 }
 0x691   : > { %v2444_v30 = vpop.f32.mrb[22].mxu1 }
 0x692   : > { %v4255_v31 = vpop.f32.mrb[23].mxu1  ;;  %v2457_v32 = vsel %vm1112_vm4, %v2444_v30, -inf }
 0x693   : > { %2458 = vmax.xlane.f32.xlu0 %v2457_v32 }
 0x6a0   : > { %4628 = vrot.lane.b32.xlu1 %v4985_v2, %s4742_s30 }
 0x6a4   : > { %2566 = vrot.lane.b32.xlu1 %v5009_v10, %s4741_s28 }
 0x6a8   : > { %4633 = vrot.lane.b32.xlu1 %v4990_v6, %s4742_s30 }
 0x6a9   : > { %2490 = vrot.lane.b32.xlu0 %v4999_v8, %s4741_s28 }
 0x6ac   : > { %4643 = vrot.lane.b32.xlu1 %v4990_v6, %s4743_s14 }
 0x6ad   : > { %4638 = vrot.lane.b32.xlu0 %v4985_v2, %s4743_s14 }
 0x6b0   : > { %2895 = vrot.lane.b32.xlu1 %v5005_v9, %s4743_s14 }
 0x6b1   : > { %2813 = vrot.lane.b32.xlu0 %v4995_v7, %s4743_s14 }
 0x6b4   : > { %3051 = vrot.lane.b32.xlu1 %v5005_v9, %s4744_s15 }
 0x6b5   : > { %2977 = vrot.lane.b32.xlu0 %v4995_v7, %s4744_s15 }
 0x718   : > { %v2450_v33 = vpop.xlane.xlu0 %2449 }
 0x71c   : > { %v2456_v17 = vpop.xlane.xlu1 %2455  ;;  %v2453_v37 = vpop.xlane.xlu0 %2452 }
 0x71d   : > { %v2460_v36 = vmax.f32 %v2450_v33, %v2456_v17 }
 0x71f   : > { %v2468_v38 = vsub.f32 %v2370_v23, %v2460_v36  ;;  %v2462_v42 = vsub.f32 %v2214_v21, %v2460_v36 }
 0x720   : > { %v4629_v39 = vpop.permute.xlu1 %4628  ;;  %v2459_v40 = vpop.xlane.xlu0 %2458 }
 0x721   : > { %v2470_v25 = vmul.f32 1.442695, %v2468_v38  ;;  %v2461_v41 = vmax.f32 %v2453_v37, %v2459_v40  ;;  %v2464_v7 = vmul.f32 1.442695, %v2462_v42  ;;  %v4631_v50 = vunpack.i.h.bf16 %v4629_v39 }
 0x722   : > { %v4630_v52 = vunpack.i.l.bf16 %v4629_v39 }
 0x723   : > { %4685 = vpow2.f32 %v2470_v25  ;;  %v2469_v43 = vsub.f32 %v2444_v30, %v2461_v41  ;;  %v2463_v9 = vsub.f32 %v2296_v26, %v2461_v41 }
 0x724   : > { %v2567_v44 = vpop.permute.xlu1 %2566  ;;  %v2491_v46 = vpop.permute.xlu0 %2490  ;;  %v4470_v34 = vpack.c.bf16 %v4631_v50, %v4630_v52 }
 0x725   : > { %4262 = vmatpush3.msra.mxu1 %v2567_v44  ;;  %v2472_v48 = vmul.f32 1.442695, %v2469_v43  ;;  %4257 = vmatpush3.msra.mxu0 %v2491_v46  ;;  %v2466_v55 = vmul.f32 1.442695, %v2463_v9  ;;  %v1795_v43 = vsel %vm799_vm2, %v5142_v59, 0.0  ;;  %v1801_v44 = vsel %vm1112_vm4, %v5129_v47, 0.0 }
 0x726   : > { %4472 = vmatprep.subr.bf16.mxu1 %v4736_v62  ;;  %4469 = vmatprep.subr.bf16.mxu0 %v4736_v62 }
 0x727   : > { %4687 = vpow2.f32 %v2472_v48 }
 0x728   : > { %4689 = vpow2.f32 %v2464_v7  ;;  %v4634_v53 = vpop.permute.xlu1 %4633  ;;  %v4639_v35 = vpop.permute.xlu0 %4638 }
 0x729   : > { %v4636_v58 = vunpack.i.h.bf16 %v4634_v53  ;;  %v4635_v61 = vunpack.i.l.bf16 %v4634_v53  ;;  %4691 = vpow2.f32 %v2466_v55  ;;  %v4641_v11 = vunpack.i.h.bf16 %v4639_v35 }
 0x72a   : > { %v4640_v12 = vunpack.i.l.bf16 %v4639_v35 }
 0x72b   : > { %v4473_v1 = vpack.c.bf16 %v4636_v58, %v4635_v61 }
 0x72c   : > { %v4644_v13 = vpop.permute.xlu1 %4643  ;;  %v4476_v18 = vpack.c.bf16 %v4641_v11, %v4640_v12  ;;  %v2814_v22 = vpop.permute.xlu0 %2813 }
 0x72d   : > { %v5207_v57 = vpop.eup %4685  ;;  %v4646_v20 = vunpack.i.h.bf16 %v4644_v13  ;;  %v4645_v21 = vunpack.i.l.bf16 %v4644_v13 }
 0x72e   : > { %4259 = vmatmul.mubr.msk.f32.vlgmr.msra.gmra.mrb[16].mxu0 %vm1112_vm4, %v5207_v57 }
 0x72f   : > { %4471 = vmatpush3.bf16.msra.mxu0 %v4470_v34  ;;  %4270 = vmatprep.mubr.msk.f32.mxu0 %vm4737_vm1, %v4735_v49  ;;  %v4480_v23 = vpack.c.bf16 %v4646_v20, %v4645_v21 }
 0x730   : > { %4475 = vmatprep.subr.bf16.mxu0 %v4736_v62  ;;  %v2896_v26 = vpop.permute.xlu1 %2895  ;;  %v2978_v27 = vpop.permute.xlu0 %2977 }
 0x731   : > { %v5214_v63 = vpop.eup %4687 }
 0x732   : > { %4264 = vmatmul.mubr.msk.f32.vlgmr.msra.gmra.mrb[24].mxu1 %vm1112_vm4, %v5214_v63  ;;  %v5220_v14 = vpop.eup %4689 }
 0x733   : > { %4474 = vmatpush3.bf16.msra.mxu1 %v4473_v1  ;;  %4277 = vmatprep.mubr.msk.f32.mxu1 %vm4737_vm1, %v4735_v49  ;;  %v4692_v16 = vpop.eup %4691  ;;  %v2474_v47 = vsel %vm799_vm2, %v5220_v14, 0.0 }
 0x734   : > { %4479 = vmatprep.subr.bf16.mxu1 %v4736_v62  ;;  %v3052_v24 = vpop.permute.xlu1 %3051  ;;  %v2477_v59 = vsel %vm799_vm2, %v4692_v16, 0.0 }
 0x736   : > { %4271 = vmatmul.mubr.msk.f32.vlgmr.msra.gmra.mrb[16].mxu0 %vm799_vm2, %v5220_v14 }
 0x737   : > { %4284 = vmatprep.mubr.msk.f32.mxu0 %vm4737_vm1, %v4735_v49 }
 0x738   : > { %4478 = vmatpush3.bf16.xpose.msk.msra.mxu0 %vm4981_vm3, %v4476_v18 }
 0x739   : > { %4294 = vmatprep.subr.mxu0 %v4735_v49 }
 0x73a   : > { %4278 = vmatmul.mubr.msk.f32.vlgmr.msra.gmra.mrb[24].mxu1 %vm799_vm2, %v4692_v16 }
 0x73b   : > { %4291 = vmatprep.mubr.msk.f32.mxu1 %vm4737_vm1, %v4735_v49 }
 0x73c   : > { %4482 = vmatpush3.bf16.xpose.msk.msra.mxu1 %vm4981_vm3, %v4480_v23 }
 0x73d   : > { %4299 = vmatprep.subr.mxu1 %v4735_v49 }
 0x73f   : > { %4285 = vmatmul.mubr.msk.f32.vlgmr.msra.gmra.mrb[18].mxu0 %vm799_vm2, %v2814_v22 }
 0x740   : > { %4295 = vmatpush3.xpose.msk.msra.mxu0 %vm799_vm2, %v2978_v27  ;;  %4296 = vmatprep.mubr.msk.f32.mxu0 %vm4737_vm1, %v4735_v49 }
 0x741   : > { %4304 = vmatprep.subr.mxu0 %v4735_v49 }
 0x743   : > { %4297 = vmatmul.mubr.msk.f32.vlgmr.msra.gmra.mrb[20].mxu0 %vm799_vm2, %v2814_v22  ;;  %4292 = vmatmul.mubr.msk.f32.vlgmr.msra.gmra.mrb[26].mxu1 %vm799_vm2, %v2896_v26 }
 0x744   : > { %4306 = vmatprep.mubr.msk.f32.mxu0 %vm4737_vm1, %v4735_v49  ;;  %4300 = vmatpush3.xpose.msk.msra.mxu1 %vm799_vm2, %v3052_v24 }
 0x745   : > { %4301 = vmatprep.mubr.msk.f32.mxu1 %vm4737_vm1, %v4735_v49  ;;  %4309 = vmatprep.subr.mxu1 %v4735_v49 }
 0x747   : > { %4302 = vmatmul.mubr.msk.f32.vlgmr.msra.gmra.mrb[28].mxu1 %vm799_vm2, %v2896_v26 }
 0x748   : > { %4311 = vmatprep.mubr.msk.f32.mxu1 %vm4737_vm1, %v4735_v49 }
 0x809   : > { %v5252_v0 = vpop.f32.mrb[16].mxu0 }
 0x80a   : > { %v4272_v28 = vpop.f32.mrb[17].mxu0 }
 0x80d   : > { %v5254_v29 = vpop.f32.mrb[24].mxu1 }
 0x80e   : > { %v4279_v30 = vpop.f32.mrb[25].mxu1 }
 0x80f   : > { %v1133_v30 = vsel %vm799_vm2, %v5064_v56, 0.0 }
 0x812   : > { %v2891_v31 = vpop.f32.mrb[18].mxu0 }
 0x813   : > { %v4286_v32 = vpop.f32.mrb[19].mxu0  ;;  %v3125_v33 = vsel %vm799_vm2, %v2891_v31, -inf }
 0x814   : > { %3126 = vmax.xlane.f32.xlu0 %v3125_v33  ;;  %v1136_v32 = vsel %vm799_vm2, %v5074_v60, 0.0  ;;  %v1142_v33 = vsel %vm1112_vm4, %v5058_v51, 0.0 }
 0x816   : > { %v3047_v17 = vpop.f32.mrb[20].mxu0  ;;  %v2973_v36 = vpop.f32.mrb[26].mxu1 }
 0x817   : > { %v4298_v37 = vpop.f32.mrb[21].mxu0  ;;  %v3131_v38 = vsel %vm1112_vm4, %v3047_v17, -inf  ;;  %v4293_v39 = vpop.f32.mrb[27].mxu1  ;;  %v3128_v25 = vsel %vm799_vm2, %v2973_v36, -inf }
 0x818   : > { %3132 = vmax.xlane.f32.xlu1 %v3131_v38  ;;  %3129 = vmax.xlane.f32.xlu0 %v3128_v25 }
 0x81a   : > { %v3121_v40 = vpop.f32.mrb[28].mxu1 }
 0x81b   : > { %v4303_v41 = vpop.f32.mrb[29].mxu1  ;;  %v3134_v42 = vsel %vm1112_vm4, %v3121_v40, -inf }
 0x81c   : > { %3135 = vmax.xlane.f32.xlu0 %v3134_v42 }
 0x829   : > { %3243 = vrot.lane.b32.xlu1 %v5009_v10, %s4743_s14  ;;  %v1798_v10 = vsel %vm799_vm2, %v5152_v4, 0.0 }
 0x82d   : > { %4648 = vrot.lane.b32.xlu1 %v4985_v2, %s4744_s15  ;;  %v2480_v2 = vsel %vm1112_vm4, %v5207_v57, 0.0 }
 0x831   : > { %4653 = vrot.lane.b32.xlu1 %v4990_v6, %s4744_s15  ;;  %v1804_v6 = vsel %vm1112_vm4, %v5136_v54, 0.0 }
 0x832   : > { %3167 = vrot.lane.b32.xlu0 %v4999_v8, %s4743_s14  ;;  %v2483_v8 = vsel %vm1112_vm4, %v5214_v63, 0.0 }
 0x851   : > { %1796 = vadd.xlane.f32.xlu0 %v1795_v43 }
 0x855   : > { %1802 = vadd.xlane.f32.xlu1 %v1801_v44  ;;  %1799 = vadd.xlane.f32.xlu0 %v1798_v10 }
 0x859   : > { %2481 = vadd.xlane.f32.xlu1 %v2480_v2  ;;  %1805 = vadd.xlane.f32.xlu0 %v1804_v6 }
 0x85d   : > { %2484 = vadd.xlane.f32.xlu1 %v2483_v8  ;;  %2475 = vadd.xlane.f32.xlu0 %v2474_v47 }
 0x861   : > { %2478 = vadd.xlane.f32.xlu0 %v2477_v59 }
 0x8a1   : > { %v3127_v4 = vpop.xlane.xlu0 %3126 }
 0x8a5   : > { %v3133_v46 = vpop.xlane.xlu1 %3132  ;;  %v3130_v7 = vpop.xlane.xlu0 %3129 }
 0x8a6   : > { %v3137_v48 = vmax.f32 %v3127_v4, %v3133_v46 }
 0x8a8   : > { %v3139_v9 = vsub.f32 %v2891_v31, %v3137_v48  ;;  %v3145_v50 = vsub.f32 %v3047_v17, %v3137_v48  ;;  %v1139_v31 = vsel %vm1112_vm4, %v5051_v45, 0.0 }
 0x8a9   : > { %v3244_v52 = vpop.permute.xlu1 %3243  ;;  %v3136_v55 = vpop.xlane.xlu0 %3135 }
 0x8aa   : > { %v3141_v54 = vmul.f32 1.442695, %v3139_v9  ;;  %v3147_v53 = vmul.f32 1.442695, %v3145_v50  ;;  %4310 = vmatpush3.msra.mxu1 %v3244_v52  ;;  %v3138_v57 = vmax.f32 %v3130_v7, %v3136_v55 }
 0x8ab   : > { %4486 = vmatprep.subr.bf16.mxu1 %v4736_v62 }
 0x8ac   : > { %4693 = vpow2.f32 %v3141_v54  ;;  %v3140_v34 = vsub.f32 %v2973_v36, %v3138_v57  ;;  %v3146_v58 = vsub.f32 %v3121_v40, %v3138_v57 }
 0x8ad   : > { %4695 = vpow2.f32 %v3147_v53  ;;  %v3168_v61 = vpop.permute.xlu0 %3167  ;;  %v4649_v1 = vpop.permute.xlu1 %4648 }
 0x8ae   : > { %v3143_v35 = vmul.f32 1.442695, %v3140_v34  ;;  %v3149_v63 = vmul.f32 1.442695, %v3146_v58  ;;  %4305 = vmatpush3.msra.mxu0 %v3168_v61  ;;  %v4651_v11 = vunpack.i.h.bf16 %v4649_v1  ;;  %v4650_v12 = vunpack.i.l.bf16 %v4649_v1 }
 0x8af   : > { %4483 = vmatprep.subr.bf16.mxu0 %v4736_v62 }
 0x8b0   : > { %4697 = vpow2.f32 %v3143_v35  ;;  %v4484_v20 = vpack.c.bf16 %v4651_v11, %v4650_v12  ;;  %v3496_v12 = vld [vmem:[%s5459_s8 + $0x20] sm:$0xff] }
 0x8b1   : > { %4699 = vpow2.f32 %v3149_v63  ;;  %v4654_v13 = vpop.permute.xlu1 %4653 }
 0x8b2   : > { %v4656_v22 = vunpack.i.h.bf16 %v4654_v13  ;;  %v4655_v16 = vunpack.i.l.bf16 %v4654_v13  ;;  %v3497_v13 = vld [vmem:[%s5459_s8 + $0x28] sm:$0xff] }
 0x8b4   : > { %v4487_v27 = vpack.c.bf16 %v4656_v22, %v4655_v16 }
 0x8b6   : > { %v4694_v14 = vpop.eup %4693 }
 0x8b7   : > { %v4696_v18 = vpop.eup %4695  ;;  %v3151_v21 = vsel %vm799_vm2, %v4694_v14, 0.0 }
 0x8b8   : > { %4307 = vmatmul.mubr.msk.f32.vlgmr.msra.gmra.mrb[22].mxu0 %vm1112_vm4, %v4696_v18  ;;  %v3157_v23 = vsel %vm1112_vm4, %v4696_v18, 0.0  ;;  %3152 = vadd.xlane.f32.xlu0 %v3151_v21  ;;  %v3498_v18 = vld [vmem:[%s5459_s8 + $0x30] sm:$0xff] }
 0x8b9   : > { %4485 = vmatpush3.bf16.msra.mxu0 %v4484_v20  ;;  %3158 = vadd.xlane.f32.xlu1 %v3157_v23  ;;  %v3499_v20 = vld [vmem:[%s5459_s8 + $0x38] sm:$0xff] }
 0x8ba   : > { %4318 = vmatprep.mubr.msk.f32.mxu0 %vm4737_vm1, %v4735_v49  ;;  %v4698_v62 = vpop.eup %4697  ;;  %v4501_v21 = vpack.c.bf16 %v3499_v20, %v3498_v18  ;;  %v3736_v18 = vld [vmem:[%s5463_s12 + $0x10] sm:$0xff]  ;;  %v3737_v20 = vld [vmem:[%s5463_s12 + $0x18] sm:$0xff] }
 0x8bb   : > { %v4700_v26 = vpop.eup %4699  ;;  %v3154_v24 = vsel %vm799_vm2, %v4698_v62, 0.0 }
 0x8bc   : > { %4312 = vmatmul.mubr.msk.f32.vlgmr.msra.gmra.mrb[30].mxu1 %vm1112_vm4, %v4700_v26  ;;  %v3160_v28 = vsel %vm1112_vm4, %v4700_v26, 0.0  ;;  %3155 = vadd.xlane.f32.xlu0 %v3154_v24 }
 0x8bd   : > { %4488 = vmatpush3.bf16.msra.mxu1 %v4487_v27  ;;  %3161 = vadd.xlane.f32.xlu1 %v3160_v28 }
 0x8be   : > { %4325 = vmatprep.mubr.msk.f32.mxu1 %vm4737_vm1, %v4735_v49 }
 0x8c0   : > { %4319 = vmatmul.mubr.msk.f32.vlgmr.msra.gmra.mrb[22].mxu0 %vm799_vm2, %v4694_v14  ;;  %1134 = vadd.xlane.f32.xlu0 %v1133_v30  ;;  %v4497_v14 = vpack.c.bf16 %v3497_v13, %v3496_v12 }
 0x8c1   : > { %1140 = vadd.xlane.f32.xlu1 %v1139_v31 }
 0x8c4   : > { %4326 = vmatmul.mubr.msk.f32.vlgmr.msra.gmra.mrb[30].mxu1 %vm799_vm2, %v4698_v62  ;;  %1137 = vadd.xlane.f32.xlu0 %v1136_v32 }
 0x8c5   : > { %1143 = vadd.xlane.f32.xlu1 %v1142_v33 }
 0x8de   : > { %v1797_v49 = vpop.xlane.xlu0 %1796 }
 0x8e2   : > { %v1803_v17 = vpop.xlane.xlu1 %1802  ;;  %v1800_v37 = vpop.xlane.xlu0 %1799 }
 0x8e3   : > { %v1807_v36 = vadd.f32 %v1803_v17, %v1797_v49  ;;  %v4725_v17 = vld [vmem:[%s4837_s18 + $0x8] sm:$0xff] }
 0x8e5   : > { %4701 = vrcp.f32 %v1807_v36 }
 0x8e6   : > { %v1806_v56 = vpop.xlane.xlu0 %1805  ;;  %v2482_v45 = vpop.xlane.xlu1 %2481 }
 0x8e7   : > { %v1808_v38 = vadd.f32 %v1806_v56, %v1800_v37  ;;  %v4726_v56 = vld [vmem:[%s4837_s18] sm:$0xff] }
 0x8e9   : > { %4703 = vrcp.f32 %v1808_v38 }
 0x8ea   : > { %v2476_v39 = vpop.xlane.xlu0 %2475  ;;  %v2485_v40 = vpop.xlane.xlu1 %2484 }
 0x8eb   : > { %v2486_v25 = vadd.f32 %v2482_v45, %v2476_v39 }
 0x8ed   : > { %4705 = vrcp.f32 %v2486_v25 }
 0x8ee   : > { %v2479_v41 = vpop.xlane.xlu0 %2478 }
 0x8ef   : > { %v4702_v60 = vpop.eup %4701  ;;  %v2487_v42 = vadd.f32 %v2485_v40, %v2479_v41 }
 0x8f0   : > { %v2123_v51 = vmul.f32 %v4702_v60, %v5177_v15  ;;  %v3492_v15 = vld [vmem:[%s5459_s8] sm:$0xff] }
 0x8f1   : > { %4707 = vrcp.f32 %v2487_v42 }
 0x8f2   : > { %2127 = vrot.lane.b32.xlu0 %v2123_v51, %s4744_s15 }
 0x8f3   : > { %v4704_v43 = vpop.eup %4703 }
 0x8f4   : > { %v2124_v44 = vmul.f32 %v4704_v43, %v5179_v19  ;;  %v3493_v19 = vld [vmem:[%s5459_s8 + $0x8] sm:$0xff] }
 0x8f5   : > { %v4489_v47 = vpack.c.bf16 %v3493_v19, %v3492_v15  ;;  %v3629_v19 = vld [vmem:[%s5462_s11 + $0x10] sm:$0xff] }
 0x8f6   : > { %2129 = vrot.lane.b32.xlu1 %v2124_v44, %s4744_s15 }
 0x8f7   : > { %v4706_v10 = vpop.eup %4705  ;;  %4490 = vmatprep.subr.bf16.mxu0 %v4489_v47 }
 0x8f8   : > { %v2800_v2 = vmul.f32 %v4706_v10, %v5252_v0  ;;  %4492 = vmatpush3.bf16.msra.mxu0 %v4489_v47  ;;  %v3630_v47 = vld [vmem:[%s5462_s11 + $0x18] sm:$0xff] }
 0x8fa   : > { %2804 = vrot.lane.b32.xlu1 %v2800_v2, %s4742_s30 }
 0x8fb   : > { %v4708_v6 = vpop.eup %4707 }
 0x8fc   : > { %v2801_v8 = vmul.f32 %v4708_v6, %v5254_v29  ;;  %v3627_v6 = vld [vmem:[%s5462_s11] sm:$0xff] }
 0x8fe   : > { %2806 = vrot.lane.b32.xlu1 %v2801_v8, %s4742_s30  ;;  %v3628_v8 = vld [vmem:[%s5462_s11 + $0x8] sm:$0xff] }
 0x8ff   : > { %v4505_v15 = vpack.c.bf16 %v3628_v8, %v3627_v6 }
 0x901   : > { %4506 = vmatprep.subr.bf16.mxu1 %v4505_v15 }
 0x902   : > { %4508 = vmatpush3.bf16.msra.mxu1 %v4505_v15 }
 0x945   : > { %v3153_v59 = vpop.xlane.xlu0 %3152 }
 0x946   : > { %v3159_v0 = vpop.xlane.xlu1 %3158 }
 0x947   : > { %v3163_v1 = vadd.f32 %v3159_v0, %v3153_v59  ;;  %v4509_v59 = vpack.c.bf16 %v3630_v47, %v3629_v19  ;;  %v3631_v0 = vld [vmem:[%s5462_s11 + $0x20] sm:$0xff] }
 0x949   : > { %v3156_v4 = vpop.xlane.xlu0 %3155  ;;  %4510 = vmatprep.subr.bf16.mxu1 %v4509_v59 }
 0x94a   : > { %v3162_v46 = vpop.xlane.xlu1 %3161  ;;  %4512 = vmatpush3.bf16.msra.mxu1 %v4509_v59 }
 0x94b   : > { %v3164_v48 = vadd.f32 %v3162_v46, %v3156_v4  ;;  %v3632_v4 = vld [vmem:[%s5462_s11 + $0x28] sm:$0xff] }
 0x94c   : > { %v4513_v46 = vpack.c.bf16 %v3632_v4, %v3631_v0 }
 0x94d   : > { %v1135_v7 = vpop.xlane.xlu0 %1134 }
 0x94e   : > { %v1141_v29 = vpop.xlane.xlu1 %1140  ;;  %4514 = vmatprep.subr.bf16.mxu1 %v4513_v46 }
 0x94f   : > { %v1145_v9 = vadd.f32 %v1141_v29, %v1135_v7  ;;  %4516 = vmatpush3.bf16.msra.mxu1 %v4513_v46  ;;  %v3634_v7 = vld [vmem:[%s5462_s11 + $0x38] sm:$0xff] }
 0x951   : > { %4709 = vrcp.f32 %v1145_v9  ;;  %v1138_v50 = vpop.xlane.xlu0 %1137  ;;  %v3734_v9 = vld [vmem:[%s5463_s12] sm:$0xff] }
 0x952   : > { %v1144_v52 = vpop.xlane.xlu1 %1143 }
 0x953   : > { %v1146_v54 = vadd.f32 %v1144_v52, %v1138_v50  ;;  %v3735_v50 = vld [vmem:[%s5463_s12 + $0x8] sm:$0xff] }
 0x954   : > { %v4521_v52 = vpack.c.bf16 %v3735_v50, %v3734_v9 }
 0x955   : > { %4711 = vrcp.f32 %v1146_v54 }
 0x956   : > { %4713 = vrcp.f32 %v3163_v1  ;;  %v3978_v1 = vld [vmem:[%s5461_s10] ss:$0 sm:$0xff] }
 0x957   : > { %4715 = vrcp.f32 %v3164_v48  ;;  %v3633_v48 = vld [vmem:[%s5462_s11 + $0x30] sm:$0xff] }
 0x958   : > { %v4517_v29 = vpack.c.bf16 %v3634_v7, %v3633_v48 }
 0x95a   : > { %4518 = vmatprep.subr.bf16.mxu1 %v4517_v29 }
 0x95b   : > { %v4710_v53 = vpop.eup %4709  ;;  %4520 = vmatpush3.bf16.msra.mxu1 %v4517_v29 }
 0x95c   : > { %v1453_v55 = vmul.f32 %v4710_v53, %v5099_v3  ;;  %v3494_v3 = vld [vmem:[%s5459_s8 + $0x10] sm:$0xff] }
 0x95e   : > { %1455 = vst.msk [vmem:[#allocation2] sm:$0xff] %vm799_vm2, %v1453_v55 }
 0x95f   : > { %v4712_v57 = vpop.eup %4711 }
 0x960   : > { %v1454_v34 = vmul.f32 %v4712_v57, %v5101_v5  ;;  %v3495_v5 = vld [vmem:[%s5459_s8 + $0x18] sm:$0xff]  ;;  %v4714_v22 = vpop.eup %4713 }
 0x961   : > { %v4493_v11 = vpack.c.bf16 %v3495_v5, %v3494_v3  ;;  %v4716_v26 = vpop.eup %4715 }
 0x962   : > { %1456 = vst.msk [vmem:[#allocation2 + $0x8] sm:$0xff] %vm799_vm2, %v1454_v34 }
 0x963   : > { %4494 = vmatprep.subr.bf16.mxu0 %v4493_v11 }
 0x964   : > { %v2128_v58 = vpop.permute.xlu0 %2127  ;;  %4496 = vmatpush3.bf16.msra.mxu0 %v4493_v11 }
 0x965   : > { %2134 = vst.msk [vmem:[#allocation2] sm:$0xff] %vm2133_vm5, %v2128_v58  ;;  %4498 = vmatprep.subr.bf16.mxu0 %v4497_v14 }
 0x968   : > { %v2130_v61 = vpop.permute.xlu1 %2129  ;;  %4500 = vmatpush3.bf16.msra.mxu0 %v4497_v14 }
 0x969   : > { %2135 = vst.msk [vmem:[#allocation2 + $0x8] sm:$0xff] %vm2133_vm5, %v2130_v61  ;;  %4502 = vmatprep.subr.bf16.mxu0 %v4501_v21 }
 0x96c   : > { %v2805_v35 = vpop.permute.xlu1 %2804  ;;  %4504 = vmatpush3.bf16.msra.mxu0 %v4501_v21  ;;  %v4525_v21 = vpack.c.bf16 %v3737_v20, %v3736_v18 }
 0x96d   : > { %2811 = vst.msk [vmem:[#allocation2] sm:$0xff] %vm2810_vm6, %v2805_v35  ;;  %4522 = vmatprep.subr.bf16.mxu0 %v4521_v52  ;;  %v3977_v35 = vld [vmem:[%s5460_s9] ss:$0 sm:$0xff] }
 0x970   : > { %v2807_v63 = vpop.permute.xlu1 %2806 }
 0x971   : > { %2812 = vst.msk [vmem:[#allocation2 + $0x8] sm:$0xff] %vm2810_vm6, %v2807_v63 }
 0x993   : > { %v3394_v16 = vpop.f32.mrb[22].mxu0 }
 0x994   : > { %v3477_v23 = vmul.f32 %v4714_v22, %v3394_v16  ;;  %v4320_v62 = vpop.f32.mrb[23].mxu0  ;;  %v3738_v22 = vld [vmem:[%s5463_s12 + $0x20] sm:$0xff]  ;;  %v3739_v16 = vld [vmem:[%s5463_s12 + $0x28] sm:$0xff] }
 0x995   : > { %v3740_v62 = vld [vmem:[%s5463_s12 + $0x30] sm:$0xff] }
 0x996   : > { %3481 = vrot.lane.b32.xlu0 %v3477_v23, %s4740_s26  ;;  %v4529_v23 = vpack.c.bf16 %v3739_v16, %v3738_v22 }
 0x997   : > { %v3473_v27 = vpop.f32.mrb[30].mxu1 }
 0x998   : > { %v3478_v24 = vmul.f32 %v4716_v26, %v3473_v27  ;;  %v4327_v28 = vpop.f32.mrb[31].mxu1  ;;  %v3741_v26 = vld [vmem:[%s5463_s12 + $0x38] sm:$0xff] }
 0x999   : > { %v4533_v27 = vpack.c.bf16 %v3741_v26, %v3740_v62  ;;  %v3743_v28 = vld [vmem:[%s5463_s12 + $0x48] sm:$0xff] }
 0x99a   : > { %3483 = vrot.lane.b32.xlu1 %v3478_v24, %s4740_s26  ;;  %v3742_v24 = vld [vmem:[%s5463_s12 + $0x40] sm:$0xff] }
 0xa08   : > { %v3482_v30 = vpop.permute.xlu0 %3481 }
 0xa09   : > { %3488 = vst.msk [vmem:[#allocation2] sm:$0xff] %vm3487_vm7, %v3482_v30  ;;  %v4537_v30 = vpack.c.bf16 %v3743_v28, %v3742_v24 }
 0xa0c   : > { %v3484_v31 = vpop.permute.xlu1 %3483 }
 0xa0d   : > { %3489 = vst.msk [vmem:[#allocation2 + $0x8] sm:$0xff] %vm3487_vm7, %v3484_v31  ;;  %v3744_v31 = vld [vmem:[%s5463_s12 + $0x50] sm:$0xff] }
 0xa10   : > { %v3490_v32 = vld [vmem:[#allocation2] sm:$0xff] }
 0xa11   : > { %4344 = vmatprep.mubr.msk.f32.mxu0 %vm477_vm0, %v3490_v32  ;;  %v3745_v32 = vld [vmem:[%s5463_s12 + $0x58] sm:$0xff] }
 0xa14   : > { %v3491_v33 = vld [vmem:[#allocation2 + $0x8] sm:$0xff] }
 0xa15   : > { %4345 = vmatmul.mubr.msk.f32.vlgmr.msra.gmra.mrb[24].mxu0 %vm477_vm0, %v3491_v33  ;;  %v3746_v33 = vld [vmem:[%s5463_s12 + $0x60] sm:$0xff] }
 0xa16   : > { %4524 = vmatpush3.bf16.msra.mxu0 %v4521_v52 }
 0xa17   : > { %4526 = vmatprep.subr.bf16.mxu0 %v4525_v21 }
 0xa1a   : > { %4528 = vmatpush3.bf16.msra.mxu0 %v4525_v21 }
 0xa1b   : > { %4530 = vmatprep.subr.bf16.mxu0 %v4529_v23 }
 0xa1e   : > { %4532 = vmatpush3.bf16.msra.mxu0 %v4529_v23 }
 0xa1f   : > { %4534 = vmatprep.subr.bf16.mxu0 %v4533_v27 }
 0xa22   : > { %4536 = vmatpush3.bf16.msra.mxu0 %v4533_v27 }
 0xa23   : > { %4538 = vmatprep.subr.bf16.mxu0 %v4537_v30 }
 0xa26   : > { %4540 = vmatpush3.bf16.msra.mxu0 %v4537_v30 }
 0xae8   : > { %v4346_v49 = vpop.f32.mrb[24].mxu0 }
 0xae9   : > { %v5346_v36 = vadd.f32 %v4725_v17, %v4346_v49  ;;  %v3572_v37 = vpop.f32.mrb[25].mxu0  ;;  %v4541_v49 = vpack.c.bf16 %v3745_v32, %v3744_v31  ;;  %v3747_v17 = vld [vmem:[%s5463_s12 + $0x68] sm:$0xff] }
 0xaea   : > { %v5349_v38 = vadd.f32 %v4726_v56, %v3572_v37  ;;  %v4545_v37 = vpack.c.bf16 %v3747_v17, %v3746_v33  ;;  %v3748_v56 = vld [vmem:[%s5463_s12 + $0x70] sm:$0xff] }
 0xaeb   : > { %v3588_v45 = vsel %vm477_vm0, %v5346_v36, 0.0  ;;  %4542 = vmatprep.subr.bf16.mxu0 %v4541_v49 }
 0xaec   : > { %3589 = vadd.xlane.f32.xlu1 %v3588_v45  ;;  %v3585_v39 = vsel %vm477_vm0, %v5349_v38, 0.0  ;;  %v3749_v45 = vld [vmem:[%s5463_s12 + $0x78] sm:$0xff]  ;;  %4544 = vmatpush3.bf16.msra.mxu0 %v4541_v49 }
 0xaed   : > { %3586 = vadd.xlane.f32.xlu0 %v3585_v39  ;;  %4546 = vmatprep.subr.bf16.mxu0 %v4545_v37  ;;  %v4549_v39 = vpack.c.bf16 %v3749_v45, %v3748_v56 }
 0xaf0   : > { %4548 = vmatpush3.bf16.msra.mxu0 %v4545_v37 }
 0xaf1   : > { %4550 = vmatprep.subr.bf16.mxu0 %v4549_v39 }
 0xaf4   : > { %4552 = vmatpush3.bf16.msra.mxu0 %v4549_v39 }
 0xb79   : > { %v3590_v25 = vpop.xlane.xlu1 %3589 }
 0xb7a   : > { %v3592_v60 = vmul.f32 0.015625, %v3590_v25  ;;  %v3587_v40 = vpop.xlane.xlu0 %3586 }
 0xb7b   : > { %v3591_v41 = vmul.f32 0.015625, %v3587_v40 }
 0xb7c   : > { %v3594_v42 = vsub.f32 %v5346_v36, %v3592_v60 }
 0xb7d   : > { %v3593_v51 = vsub.f32 %v5349_v38, %v3591_v41 }
 0xb7e   : > { %v3596_v10 = vmul.f32 %v3594_v42, %v3594_v42 }
 0xb7f   : > { %v3595_v43 = vmul.f32 %v3593_v51, %v3593_v51 }
 0xb80   : > { %v3600_v2 = vsel %vm477_vm0, %v3596_v10, 0.0 }
 0xb81   : > { %v3597_v44 = vsel %vm477_vm0, %v3595_v43, 0.0 }
 0xb82   : > { %3598 = vadd.xlane.f32.xlu0 %v3597_v44 }
 0xb86   : > { %3601 = vadd.xlane.f32.xlu0 %v3600_v2 }
 0xc0f   : > { %v3599_v54 = vpop.xlane.xlu0 %3598 }
 0xc10   : > { %v3603_v53 = vmul.f32 0.015625, %v3599_v54 }
 0xc12   : > { %v3605_v55 = vadd.f32 1e-05, %v3603_v53 }
 0xc13   : > { %v3602_v57 = vpop.xlane.xlu0 %3601 }
 0xc14   : > { %4717 = vrsqrt.f32 %v3605_v55  ;;  %v3604_v34 = vmul.f32 0.015625, %v3602_v57 }
 0xc16   : > { %v3606_v58 = vadd.f32 1e-05, %v3604_v34 }
 0xc18   : > { %4719 = vrsqrt.f32 %v3606_v58 }
 0xc1e   : > { %v4718_v61 = vpop.eup %4717 }
 0xc1f   : > { %v3609_v63 = vmul.f32 %v4718_v61, %v3593_v51 }
 0xc21   : > { %v3617_v3 = vmul.f32 %v3977_v35, %v3609_v63 }
 0xc22   : > { %v4720_v5 = vpop.eup %4719 }
 0xc23   : > { %v3610_v11 = vmul.f32 %v4720_v5, %v3594_v42  ;;  %v3625_v12 = vadd.f32 %v3978_v1, %v3617_v3 }
 0xc25   : > { %v3618_v13 = vmul.f32 %v3977_v35, %v3610_v11  ;;  %4363 = vmatprep.mubr.msk.f32.mxu1 %vm477_vm0, %v3625_v12 }
 0xc27   : > { %v3626_v14 = vadd.f32 %v3978_v1, %v3618_v13 }
 0xc29   : > { %4364 = vmatmul.mubr.msk.f32.vlgmr.msra.gmra.mrb[32].mxu1 %vm477_vm0, %v3626_v14 }
 0xcfc   : > { %v4365_v25 = vpop.f32.mrb[32].mxu1 }
 0xcfd   : > { %v3719_v60 = vmul.f32 0.044715, %v4365_v25  ;;  %v3707_v40 = vpop.f32.mrb[33].mxu1  ;;  %v3717_v4 = vmul.f32 0.5, %v4365_v25 }
 0xcfe   : > { %v3718_v41 = vmul.f32 0.044715, %v3707_v40  ;;  %v3716_v59 = vmul.f32 0.5, %v3707_v40 }
 0xcff   : > { %v3721_v42 = vmul.f32 %v4365_v25, %v3719_v60 }
 0xd00   : > { %v3720_v51 = vmul.f32 %v3718_v41, %v3707_v40 }
 0xd01   : > { %v3723_v43 = vmul.f32 %v4365_v25, %v3721_v42 }
 0xd02   : > { %v3722_v44 = vmul.f32 %v3720_v51, %v3707_v40 }
 0xd03   : > { %v3725_v10 = vadd.f32 %v4365_v25, %v3723_v43 }
 0xd04   : > { %v3724_v2 = vadd.f32 %v3722_v44, %v3707_v40 }
 0xd05   : > { %v3727_v6 = vmul.f32 0.7978846, %v3725_v10 }
 0xd06   : > { %v3726_v8 = vmul.f32 0.7978846, %v3724_v2 }
 0xd07   : > { %4721 = vtanh.f32 %v3727_v6 }
 0xd08   : > { %4723 = vtanh.f32 %v3726_v8 }
 0xd11   : > { %v4722_v15 = vpop.eup %4721 }
 0xd12   : > { %v4724_v19 = vpop.eup %4723  ;;  %v3731_v47 = vadd.f32 1.0, %v4722_v15 }
 0xd13   : > { %v3730_v0 = vadd.f32 1.0, %v4724_v19 }
 0xd14   : > { %v3733_v48 = vmul.f32 %v3731_v47, %v3717_v4 }
 0xd15   : > { %v3732_v46 = vmul.f32 %v3730_v0, %v3716_v59 }
 0xd17   : > { %4398 = vmatprep.mubr.f32.mxu0 %v3732_v46 }
 0xd18   : > { %4399 = vmatmul.mubr.f32.vlgmr.msra.gmra.mrb[26].mxu0 %v3733_v48 }
 0xdeb   : > { %v4400_v7 = vpop.f32.mrb[26].mxu0 }
 0xdec   : > { %v3816_v29 = vpop.f32.mrb[27].mxu0  ;;  %v3826_v50 = vadd.f32 %v4400_v7, %v5346_v36 }
 0xded   : > { %v3825_v9 = vadd.f32 %v3816_v29, %v5349_v38 }
 0xdee   : > { %3828 = vst.msk [vmem:[%s467_s19 + $0x8] sm:$0xff] %vm477_vm0, %v3826_v50 }
 0xdef   : > { %3827 = vst.msk [vmem:[%s467_s19] sm:$0xff] %vm477_vm0, %v3825_v9 }
 0xdf0 PF: > { %s23_s25 = sadd.s32 1, %s4733_s25  }
 0xdf1   : > { %p20_p4 = scmp.ge.s32.totalorder %s23_s25, 4  }
 0xdf3   :  { %22 = sbr.rel (!%p20_p4) target bundleno = 1 (0x1), region = 105 }

</bundles_post_ra>
